<compile_context>
chip_gen: v7x
topology: tpu7x:2x2x1
jax: 0.10.0
libtpu: 0.0.40
codegen_flags: <defaults>
</compile_context>

<pallas_src>
import jax
import jax.numpy as jnp
from jax.experimental import pallas as pl
from jax.experimental.pallas import tpu as pltpu

# ---------------- small synthetic ViT-MAE config ----------------
IMG = 16          # input spatial size (processor resize to 224 is skipped, see TODO)
IN_CH = 3
PATCH = 4
GRID_HW = IMG // PATCH
NUM_PATCHES = GRID_HW * GRID_HW            # 16
DIN = IN_CH * PATCH * PATCH                # 48
DIN_PAD = 128                              # pad patch features to a full lane group
HIDDEN = 128
NUM_HEADS = 4
HEAD_DIM = HIDDEN // NUM_HEADS             # 32
MLP_DIM = 256
NUM_LAYERS = 2
NUM_CLASSES = 4
LOGIT_PAD = 128                            # lane-dense logits tile
MASK_RATIO = 0.75                          # ViT-MAE default random masking
LEN_KEEP = int(NUM_PATCHES * (1.0 - MASK_RATIO))   # 4
SEQ = LEN_KEEP + 1                         # +CLS = 5 (real tokens)
S_PAD = 8                                  # tokens padded to one full sublane group
LN_EPS = 1e-12                             # HF ViT layer_norm_eps
NEG_INF = -1e9                             # finite "minus infinity" for masked softmax


def _layernorm(x, g, b, eps=LN_EPS):
    # single-pass sum / sum-of-squares (one fewer XLU reduction); clamp avoids tiny negative var
    n = x.shape[-1]
    s = jnp.sum(x, axis=-1, keepdims=True)
    ss = jnp.sum(x * x, axis=-1, keepdims=True)
    mu = s * (1.0 / n)
    var = jnp.maximum(ss * (1.0 / n) - mu * mu, 0.0)
    return (x - mu) * jax.lax.rsqrt(var + eps) * g + b


# ---------------- the single fused kernel ----------------
def mae_fused_kernel(
    patches_ref,   # [BT, DIN_PAD] f32   (CLS/pad rows are zero)
    base_ref,      # [BT, H]       f32   (cls_token+pos[0] on CLS rows, patch_b+pos on kept rows)
    mask_ref,      # [BT, BT]      f32   (0 allowed / NEG_INF blocked)
    pw_ref,        # [DIN_PAD, H]  bf16
    ln1g_ref, ln1b_ref,            # [L, 1, H] f32
    wqkv_ref,      # [L, H, 3H]    bf16
    bqkv_ref,      # [L, 1, 3H]    f32
    wo_ref,        # [L, H, H]     bf16
    bo_ref,        # [L, 1, H]     f32
    ln2g_ref, ln2b_ref,            # [L, 1, H] f32
    w1_ref,        # [L, H, M]     bf16
    b1_ref,        # [L, 1, M]     f32
    w2_ref,        # [L, M, H]     bf16
    b2_ref,        # [L, 1, H]     f32
    lnfg_ref, lnfb_ref,            # [1, H] f32
    cw_ref,        # [H, LOGIT_PAD] bf16 (zero-padded columns)
    cb_ref,        # [1, LOGIT_PAD] f32
    logits_ref,    # out [BT, LOGIT_PAD] f32
    attn_ref,      # out [BT, L*nH*BT]   f32 (lane-packed attention maps)
):
    scale = 1.0 / (HEAD_DIM ** 0.5)
    mask = mask_ref[...]

    # patch embedding (Conv2d kernel=stride=PATCH as matmul) + bias + positional embeddings
    x = (
        jnp.dot(patches_ref[...].astype(jnp.bfloat16), pw_ref[...],
                preferred_element_type=jnp.float32)
        + base_ref[...]
    )                                                            # [BT, H]

    attn_blocks = []
    for l in range(NUM_LAYERS):
        # ---------- MHSA (pre-LN), fused QKV projection ----------
        h = _layernorm(x, ln1g_ref[l], ln1b_ref[l])
        qkv = (
            jnp.dot(h.astype(jnp.bfloat16), wqkv_ref[l],
                    preferred_element_type=jnp.float32)
            + bqkv_ref[l]
        )                                                        # [BT, 3H]
        ctx_heads = []
        for hi in range(NUM_HEADS):
            qh = qkv[:, hi * HEAD_DIM:(hi + 1) * HEAD_DIM]
            kh = qkv[:, HIDDEN + hi * HEAD_DIM:HIDDEN + (hi + 1) * HEAD_DIM]
            vh = qkv[:, 2 * HIDDEN + hi * HEAD_DIM:2 * HIDDEN + (hi + 1) * HEAD_DIM]
            scores = jax.lax.dot_general(
                qh, kh, (((1,), (1,)), ((), ())),
                preferred_element_type=jnp.float32) * scale + mask        # [BT, BT]
            scores = scores - jnp.max(scores, axis=-1, keepdims=True)
            e = jnp.exp(scores)
            probs = e / jnp.sum(e, axis=-1, keepdims=True)
            attn_blocks.append(probs)                                     # kept f32 (returned)
            ctx_heads.append(jnp.dot(probs, vh, preferred_element_type=jnp.float32))
        ctx = jnp.concatenate(ctx_heads, axis=-1)                         # [BT, H]
        attn_out = (
            jnp.dot(ctx.astype(jnp.bfloat16), wo_ref[l],
                    preferred_element_type=jnp.float32)
            + bo_ref[l]
        )
        x = x + attn_out

        # ---------- MLP ----------
        h2 = _layernorm(x, ln2g_ref[l], ln2b_ref[l])
        m = (
            jnp.dot(h2.astype(jnp.bfloat16), w1_ref[l],
                    preferred_element_type=jnp.float32)
            + b1_ref[l]
        )
        # TODO(synk): HF ViT uses exact (erf) GELU; tanh approximation used for robust Mosaic lowering.
        m = jax.nn.gelu(m, approximate=True)
        x = x + (
            jnp.dot(m.astype(jnp.bfloat16), w2_ref[l],
                    preferred_element_type=jnp.float32)
            + b2_ref[l]
        )

    # ---------- final layernorm + classifier head ----------
    # TODO(synk): nn.Dropout(p=0.6) is identity at inference (eval mode); not applied.
    hf = _layernorm(x, lnfg_ref[...], lnfb_ref[...])
    logits_ref[...] = (
        jnp.dot(hf.astype(jnp.bfloat16), cw_ref[...],
                preferred_element_type=jnp.float32)
        + cb_ref[...]
    )
    # single lane-dense store of ALL attention maps (L * nH * BT = 128 lanes for this config)
    attn_ref[...] = jnp.concatenate(attn_blocks, axis=-1)


def _fused_forward_call(patches_seq, add_base, attn_mask, p):
    BT = patches_seq.shape[0]
    ATT_W = NUM_LAYERS * NUM_HEADS * BT
    vmem = pl.BlockSpec(memory_space=pltpu.MemorySpace.VMEM)
    bf16 = jnp.bfloat16
    args = (
        patches_seq, add_base, attn_mask,
        jnp.pad(p["patch_w"], ((0, DIN_PAD - DIN), (0, 0))).astype(bf16),
        p["ln1_g"], p["ln1_b"],
        p["wqkv"].astype(bf16), p["bqkv"],
        p["wo"].astype(bf16), p["bo"],
        p["ln2_g"], p["ln2_b"],
        p["w1"].astype(bf16), p["b1"],
        p["w2"].astype(bf16), p["b2"],
        p["ln_f_g"], p["ln_f_b"],
        jnp.pad(p["clf_w"], ((0, 0), (0, LOGIT_PAD - NUM_CLASSES))).astype(bf16),
        jnp.pad(p["clf_b"], ((0, 0), (0, LOGIT_PAD - NUM_CLASSES))),
    )
    return pl.pallas_call(
        mae_fused_kernel,
        in_specs=[vmem] * len(args),
        out_specs=(vmem, vmem),
        out_shape=(
            jax.ShapeDtypeStruct((BT, LOGIT_PAD), jnp.float32),
            jax.ShapeDtypeStruct((BT, ATT_W), jnp.float32),
        ),
    )(*args)


# ---------------- parameter init (deterministic, synthetic, fused layouts) ----------------
def init_params(key):
    ks = jax.random.split(key, 8)
    L = NUM_LAYERS
    p = {}
    p["patch_w"] = 0.02 * jax.random.normal(ks[0], (DIN, HIDDEN), jnp.float32)
    p["patch_b"] = jnp.zeros((1, HIDDEN), jnp.float32)
    p["pos"] = 0.02 * jax.random.normal(ks[1], (NUM_PATCHES + 1, HIDDEN), jnp.float32)
    p["cls_token"] = 0.02 * jax.random.normal(ks[2], (1, HIDDEN), jnp.float32)
    p["ln1_g"] = jnp.ones((L, 1, HIDDEN), jnp.float32)
    p["ln1_b"] = jnp.zeros((L, 1, HIDDEN), jnp.float32)
    p["wqkv"] = 0.02 * jax.random.normal(ks[3], (L, HIDDEN, 3 * HIDDEN), jnp.float32)
    p["bqkv"] = jnp.zeros((L, 1, 3 * HIDDEN), jnp.float32)
    p["wo"] = 0.02 * jax.random.normal(ks[4], (L, HIDDEN, HIDDEN), jnp.float32)
    p["bo"] = jnp.zeros((L, 1, HIDDEN), jnp.float32)
    p["ln2_g"] = jnp.ones((L, 1, HIDDEN), jnp.float32)
    p["ln2_b"] = jnp.zeros((L, 1, HIDDEN), jnp.float32)
    p["w1"] = 0.02 * jax.random.normal(ks[5], (L, HIDDEN, MLP_DIM), jnp.float32)
    p["b1"] = jnp.zeros((L, 1, MLP_DIM), jnp.float32)
    p["w2"] = 0.02 * jax.random.normal(ks[6], (L, MLP_DIM, HIDDEN), jnp.float32)
    p["b2"] = jnp.zeros((L, 1, HIDDEN), jnp.float32)
    p["ln_f_g"] = jnp.ones((1, HIDDEN), jnp.float32)
    p["ln_f_b"] = jnp.zeros((1, HIDDEN), jnp.float32)
    p["clf_w"] = 0.02 * jax.random.normal(ks[7], (HIDDEN, NUM_CLASSES), jnp.float32)
    p["clf_b"] = jnp.zeros((1, NUM_CLASSES), jnp.float32)
    return p


# ---------------- full forward (matches MAEClassifier.forward semantics) ----------------
@jax.jit
def mae_classifier_forward(x, params, mask_key):
    # Processor: rescale+normalize (ImageNet stats).
    # TODO(synk): AutoImageProcessor also PIL-resizes to 224x224; input here is already
    # at the (synthetic) model resolution, so resize is skipped.
    mean = jnp.array([0.485, 0.456, 0.406], jnp.float32).reshape(1, IN_CH, 1, 1)
    std = jnp.array([0.229, 0.224, 0.225], jnp.float32).reshape(1, IN_CH, 1, 1)
    xn = (x.astype(jnp.float32) - mean) / std

    B = xn.shape[0]
    BT = B * S_PAD

    # unfold NCHW into patches [B, N, C*P*P] (glue)
    patches = (
        xn.reshape(B, IN_CH, GRID_HW, PATCH, GRID_HW, PATCH)
        .transpose(0, 2, 4, 1, 3, 5)
        .reshape(B, NUM_PATCHES, DIN)
    )

    # ViT-MAE random masking (mask_ratio=0.75); gather of raw kept patches + their pos rows (glue).
    # (Gather commutes with the per-patch linear projection, so this matches "embed then gather".)
    noise = jax.random.uniform(mask_key, (B, NUM_PATCHES))
    ids_shuffle = jnp.argsort(noise, axis=1)
    ids_keep = ids_shuffle[:, :LEN_KEEP]                                  # [B, LEN_KEEP]
    kept_patches = jnp.take_along_axis(patches, ids_keep[:, :, None], axis=1)
    kept_pos = jnp.take(params["pos"][1:], ids_keep, axis=0)              # [B, LEN_KEEP, H]

    # batch-folded, sublane-padded token inputs: rows = [CLS, kept patches..., zero pad] per image
    zpatch_cls = jnp.zeros((B, 1, DIN), jnp.float32)
    zpatch_pad = jnp.zeros((B, S_PAD - SEQ, DIN), jnp.float32)
    patches_seq = jnp.concatenate([zpatch_cls, kept_patches, zpatch_pad], axis=1)
    patches_seq = jnp.pad(patches_seq, ((0, 0), (0, 0), (0, DIN_PAD - DIN)))
    patches_seq = patches_seq.reshape(BT, DIN_PAD)

    cls_row = params["cls_token"] + params["pos"][:1]                     # [1, H]
    base_cls = jnp.broadcast_to(cls_row[None, :, :], (B, 1, HIDDEN))
    base_patch = kept_pos + params["patch_b"]                             # [B, LEN_KEEP, H]
    base_pad = jnp.zeros((B, S_PAD - SEQ, HIDDEN), jnp.float32)
    add_base = jnp.concatenate([base_cls, base_patch, base_pad], axis=1).reshape(BT, HIDDEN)

    # block-diagonal additive mask: attend only within the same image and to non-padded keys
    row_b = jnp.arange(BT) // S_PAD
    col_pos = jnp.arange(BT) % S_PAD
    allowed = (row_b[:, None] == row_b[None, :]) & (col_pos[None, :] < SEQ)
    attn_mask = jnp.where(allowed, 0.0, NEG_INF).astype(jnp.float32)

    logits_full, attn_slab = _fused_forward_call(patches_seq, add_base, attn_mask, params)

    logits = logits_full[0::S_PAD, :NUM_CLASSES]                          # CLS rows, real classes

    # unpack lane-packed attention maps -> per-layer [B, nH, SEQ, SEQ]
    full = attn_slab.reshape(BT, NUM_LAYERS, NUM_HEADS, BT).transpose(1, 2, 0, 3)
    attentions = []
    for l in range(NUM_LAYERS):
        per_b = []
        for b in range(B):
            s = b * S_PAD
            per_b.append(full[l, :, s:s + SEQ, s:s + SEQ])
        attentions.append(jnp.stack(per_b, axis=0))                       # [B, nH, SEQ, SEQ]
    return logits, tuple(attentions)


if __name__ == "__main__":
    root = jax.random.PRNGKey(0)
    k_param, k_data, k_mask = jax.random.split(root, 3)

    params = init_params(k_param)
    x = jax.random.uniform(k_data, (2, IN_CH, IMG, IMG), jnp.float32)     # image batch in [0,1]

    logits, attentions = mae_classifier_forward(x, params, k_mask)
    jax.block_until_ready((logits, attentions))

    assert logits.shape == (2, NUM_CLASSES)
    assert len(attentions) == NUM_LAYERS
    assert attentions[0].shape == (2, NUM_HEADS, SEQ, SEQ)
    assert bool(jnp.all(jnp.isfinite(logits)))
    # attention rows over real tokens must sum to 1 (padding / cross-batch fully masked)
    assert bool(jnp.allclose(jnp.sum(attentions[0], axis=-1), 1.0, atol=1e-3))
    print("KERNEL_OK")
</pallas_src>

<mosaic_0001>
module attributes {stable_mosaic.version = 11 : i64} {
  func.func @mae_fused_kernel(%arg0: memref<16x128xf32, #tpu.memory_space<vmem>>, %arg1: memref<16x128xf32, #tpu.memory_space<vmem>>, %arg2: memref<16x16xf32, #tpu.memory_space<vmem>>, %arg3: memref<128x128xbf16, #tpu.memory_space<vmem>>, %arg4: memref<2x1x128xf32, #tpu.memory_space<vmem>>, %arg5: memref<2x1x128xf32, #tpu.memory_space<vmem>>, %arg6: memref<2x128x384xbf16, #tpu.memory_space<vmem>>, %arg7: memref<2x1x384xf32, #tpu.memory_space<vmem>>, %arg8: memref<2x128x128xbf16, #tpu.memory_space<vmem>>, %arg9: memref<2x1x128xf32, #tpu.memory_space<vmem>>, %arg10: memref<2x1x128xf32, #tpu.memory_space<vmem>>, %arg11: memref<2x1x128xf32, #tpu.memory_space<vmem>>, %arg12: memref<2x128x256xbf16, #tpu.memory_space<vmem>>, %arg13: memref<2x1x256xf32, #tpu.memory_space<vmem>>, %arg14: memref<2x256x128xbf16, #tpu.memory_space<vmem>>, %arg15: memref<2x1x128xf32, #tpu.memory_space<vmem>>, %arg16: memref<1x128xf32, #tpu.memory_space<vmem>>, %arg17: memref<1x128xf32, #tpu.memory_space<vmem>>, %arg18: memref<128x128xbf16, #tpu.memory_space<vmem>>, %arg19: memref<1x128xf32, #tpu.memory_space<vmem>>, %arg20: memref<16x128xf32, #tpu.memory_space<vmem>>, %arg21: memref<16x128xf32, #tpu.memory_space<vmem>>) attributes {dimension_semantics = [], scalar_prefetch = 0 : i64, scratch_operands = 0 : i64, tpu.core_type = #tpu.core_type<tc>} {
    %c0 = arith.constant 0 : index
    %c0_0 = arith.constant 0 : index
    %0 = vector.load %arg2[%c0, %c0_0] : memref<16x16xf32, #tpu.memory_space<vmem>>, vector<16x16xf32>
    %c0_1 = arith.constant 0 : index
    %c0_2 = arith.constant 0 : index
    %1 = vector.load %arg0[%c0_1, %c0_2] : memref<16x128xf32, #tpu.memory_space<vmem>>, vector<16x128xf32>
    %2 = arith.truncf %1 : vector<16x128xf32> to vector<16x128xbf16>
    %c0_3 = arith.constant 0 : index
    %c0_4 = arith.constant 0 : index
    %3 = vector.load %arg3[%c0_3, %c0_4] : memref<128x128xbf16, #tpu.memory_space<vmem>>, vector<128x128xbf16>
    %cst = arith.constant dense<0.000000e+00> : vector<16x128xf32>
    %4 = tpu.matmul %2, %3, %cst {dimension_numbers = #tpu.dot_dimension_numbers<[1], [0], [0], [1], [0, 0, 1, 1], [], []>} : vector<16x128xbf16>, vector<128x128xbf16>, vector<16x128xf32> -> vector<16x128xf32>
    %c0_5 = arith.constant 0 : index
    %c0_6 = arith.constant 0 : index
    %5 = vector.load %arg1[%c0_5, %c0_6] : memref<16x128xf32, #tpu.memory_space<vmem>>, vector<16x128xf32>
    %6 = arith.addf %4, %5 : vector<16x128xf32>
    %c0_7 = arith.constant 0 : index
    %c0_8 = arith.constant 0 : index
    %c0_9 = arith.constant 0 : index
    %7 = vector.load %arg4[%c0_7, %c0_8, %c0_9] : memref<2x1x128xf32, #tpu.memory_space<vmem>>, vector<1x1x128xf32>
    %8 = vector.shape_cast %7 : vector<1x1x128xf32> to vector<1x128xf32>
    %c0_10 = arith.constant 0 : index
    %c0_11 = arith.constant 0 : index
    %c0_12 = arith.constant 0 : index
    %9 = vector.load %arg5[%c0_10, %c0_11, %c0_12] : memref<2x1x128xf32, #tpu.memory_space<vmem>>, vector<1x1x128xf32>
    %10 = vector.shape_cast %9 : vector<1x1x128xf32> to vector<1x128xf32>
    %cst_13 = arith.constant dense<0.000000e+00> : vector<16xf32>
    %11 = vector.multi_reduction <add>, %6, %cst_13 [1] : vector<16x128xf32> to vector<16xf32>
    %12 = vector.shape_cast %11 : vector<16xf32> to vector<16x1xf32>
    %13 = arith.mulf %6, %6 : vector<16x128xf32>
    %cst_14 = arith.constant dense<0.000000e+00> : vector<16xf32>
    %14 = vector.multi_reduction <add>, %13, %cst_14 [1] : vector<16x128xf32> to vector<16xf32>
    %15 = vector.shape_cast %14 : vector<16xf32> to vector<16x1xf32>
    %cst_15 = arith.constant 7.812500e-03 : f32
    %16 = vector.broadcast %cst_15 : f32 to vector<16x1xf32>
    %17 = arith.mulf %12, %16 : vector<16x1xf32>
    %cst_16 = arith.constant 7.812500e-03 : f32
    %18 = vector.broadcast %cst_16 : f32 to vector<16x1xf32>
    %19 = arith.mulf %15, %18 : vector<16x1xf32>
    %20 = arith.mulf %17, %17 : vector<16x1xf32>
    %21 = arith.subf %19, %20 : vector<16x1xf32>
    %cst_17 = arith.constant 0.000000e+00 : f32
    %22 = vector.broadcast %cst_17 : f32 to vector<16x1xf32>
    %23 = arith.maximumf %21, %22 : vector<16x1xf32>
    %24 = vector.broadcast %17 : vector<16x1xf32> to vector<16x128xf32>
    %25 = arith.subf %6, %24 : vector<16x128xf32>
    %cst_18 = arith.constant 9.99999996E-13 : f32
    %26 = vector.broadcast %cst_18 : f32 to vector<16x1xf32>
    %27 = arith.addf %23, %26 : vector<16x1xf32>
    %28 = math.rsqrt %27 : vector<16x1xf32>
    %29 = vector.broadcast %28 : vector<16x1xf32> to vector<16x128xf32>
    %30 = arith.mulf %25, %29 : vector<16x128xf32>
    %31 = vector.broadcast %8 : vector<1x128xf32> to vector<16x128xf32>
    %32 = arith.mulf %30, %31 : vector<16x128xf32>
    %33 = vector.broadcast %10 : vector<1x128xf32> to vector<16x128xf32>
    %34 = arith.addf %32, %33 : vector<16x128xf32>
    %35 = arith.truncf %34 : vector<16x128xf32> to vector<16x128xbf16>
    %c0_19 = arith.constant 0 : index
    %c0_20 = arith.constant 0 : index
    %c0_21 = arith.constant 0 : index
    %36 = vector.load %arg6[%c0_19, %c0_20, %c0_21] : memref<2x128x384xbf16, #tpu.memory_space<vmem>>, vector<1x128x384xbf16>
    %37 = vector.shape_cast %36 : vector<1x128x384xbf16> to vector<128x384xbf16>
    %cst_22 = arith.constant dense<0.000000e+00> : vector<16x384xf32>
    %38 = tpu.matmul %35, %37, %cst_22 {dimension_numbers = #tpu.dot_dimension_numbers<[1], [0], [0], [1], [0, 0, 1, 1], [], []>} : vector<16x128xbf16>, vector<128x384xbf16>, vector<16x384xf32> -> vector<16x384xf32>
    %c0_23 = arith.constant 0 : index
    %c0_24 = arith.constant 0 : index
    %c0_25 = arith.constant 0 : index
    %39 = vector.load %arg7[%c0_23, %c0_24, %c0_25] : memref<2x1x384xf32, #tpu.memory_space<vmem>>, vector<1x1x384xf32>
    %40 = vector.shape_cast %39 : vector<1x1x384xf32> to vector<1x384xf32>
    %41 = vector.broadcast %40 : vector<1x384xf32> to vector<16x384xf32>
    %42 = arith.addf %38, %41 : vector<16x384xf32>
    %43 = vector.extract_strided_slice %42 {offsets = [0, 0], sizes = [16, 32], strides = [1, 1]} : vector<16x384xf32> to vector<16x32xf32>
    %44 = vector.extract_strided_slice %42 {offsets = [0, 128], sizes = [16, 32], strides = [1, 1]} : vector<16x384xf32> to vector<16x32xf32>
    %45 = vector.extract_strided_slice %42 {offsets = [0, 256], sizes = [16, 32], strides = [1, 1]} : vector<16x384xf32> to vector<16x32xf32>
    %cst_26 = arith.constant dense<0.000000e+00> : vector<16x16xf32>
    %46 = tpu.matmul %43, %44, %cst_26 {dimension_numbers = #tpu.dot_dimension_numbers<[1], [1], [0], [0], [0, 0, 1, 0], [], []>} : vector<16x32xf32>, vector<16x32xf32>, vector<16x16xf32> -> vector<16x16xf32>
    %cst_27 = arith.constant 0.176776692 : f32
    %47 = vector.broadcast %cst_27 : f32 to vector<16x16xf32>
    %48 = arith.mulf %46, %47 : vector<16x16xf32>
    %49 = arith.addf %48, %0 : vector<16x16xf32>
    %cst_28 = arith.constant dense<0xFF800000> : vector<16xf32>
    %50 = vector.multi_reduction <maximumf>, %49, %cst_28 [1] : vector<16x16xf32> to vector<16xf32>
    %51 = vector.shape_cast %50 : vector<16xf32> to vector<16x1xf32>
    %52 = vector.broadcast %51 : vector<16x1xf32> to vector<16x16xf32>
    %53 = arith.subf %49, %52 : vector<16x16xf32>
    %54 = math.exp %53 : vector<16x16xf32>
    %cst_29 = arith.constant dense<0.000000e+00> : vector<16xf32>
    %55 = vector.multi_reduction <add>, %54, %cst_29 [1] : vector<16x16xf32> to vector<16xf32>
    %56 = vector.shape_cast %55 : vector<16xf32> to vector<16x1xf32>
    %57 = vector.broadcast %56 : vector<16x1xf32> to vector<16x16xf32>
    %58 = arith.divf %54, %57 : vector<16x16xf32>
    %cst_30 = arith.constant dense<0.000000e+00> : vector<16x32xf32>
    %59 = tpu.matmul %58, %45, %cst_30 {dimension_numbers = #tpu.dot_dimension_numbers<[1], [0], [0], [1], [0, 0, 1, 1], [], []>} : vector<16x16xf32>, vector<16x32xf32>, vector<16x32xf32> -> vector<16x32xf32>
    %60 = vector.extract_strided_slice %42 {offsets = [0, 32], sizes = [16, 32], strides = [1, 1]} : vector<16x384xf32> to vector<16x32xf32>
    %61 = vector.extract_strided_slice %42 {offsets = [0, 160], sizes = [16, 32], strides = [1, 1]} : vector<16x384xf32> to vector<16x32xf32>
    %62 = vector.extract_strided_slice %42 {offsets = [0, 288], sizes = [16, 32], strides = [1, 1]} : vector<16x384xf32> to vector<16x32xf32>
    %cst_31 = arith.constant dense<0.000000e+00> : vector<16x16xf32>
    %63 = tpu.matmul %60, %61, %cst_31 {dimension_numbers = #tpu.dot_dimension_numbers<[1], [1], [0], [0], [0, 0, 1, 0], [], []>} : vector<16x32xf32>, vector<16x32xf32>, vector<16x16xf32> -> vector<16x16xf32>
    %cst_32 = arith.constant 0.176776692 : f32
    %64 = vector.broadcast %cst_32 : f32 to vector<16x16xf32>
    %65 = arith.mulf %63, %64 : vector<16x16xf32>
    %66 = arith.addf %65, %0 : vector<16x16xf32>
    %cst_33 = arith.constant dense<0xFF800000> : vector<16xf32>
    %67 = vector.multi_reduction <maximumf>, %66, %cst_33 [1] : vector<16x16xf32> to vector<16xf32>
    %68 = vector.shape_cast %67 : vector<16xf32> to vector<16x1xf32>
    %69 = vector.broadcast %68 : vector<16x1xf32> to vector<16x16xf32>
    %70 = arith.subf %66, %69 : vector<16x16xf32>
    %71 = math.exp %70 : vector<16x16xf32>
    %cst_34 = arith.constant dense<0.000000e+00> : vector<16xf32>
    %72 = vector.multi_reduction <add>, %71, %cst_34 [1] : vector<16x16xf32> to vector<16xf32>
    %73 = vector.shape_cast %72 : vector<16xf32> to vector<16x1xf32>
    %74 = vector.broadcast %73 : vector<16x1xf32> to vector<16x16xf32>
    %75 = arith.divf %71, %74 : vector<16x16xf32>
    %cst_35 = arith.constant dense<0.000000e+00> : vector<16x32xf32>
    %76 = tpu.matmul %75, %62, %cst_35 {dimension_numbers = #tpu.dot_dimension_numbers<[1], [0], [0], [1], [0, 0, 1, 1], [], []>} : vector<16x16xf32>, vector<16x32xf32>, vector<16x32xf32> -> vector<16x32xf32>
    %77 = vector.extract_strided_slice %42 {offsets = [0, 64], sizes = [16, 32], strides = [1, 1]} : vector<16x384xf32> to vector<16x32xf32>
    %78 = vector.extract_strided_slice %42 {offsets = [0, 192], sizes = [16, 32], strides = [1, 1]} : vector<16x384xf32> to vector<16x32xf32>
    %79 = vector.extract_strided_slice %42 {offsets = [0, 320], sizes = [16, 32], strides = [1, 1]} : vector<16x384xf32> to vector<16x32xf32>
    %cst_36 = arith.constant dense<0.000000e+00> : vector<16x16xf32>
    %80 = tpu.matmul %77, %78, %cst_36 {dimension_numbers = #tpu.dot_dimension_numbers<[1], [1], [0], [0], [0, 0, 1, 0], [], []>} : vector<16x32xf32>, vector<16x32xf32>, vector<16x16xf32> -> vector<16x16xf32>
    %cst_37 = arith.constant 0.176776692 : f32
    %81 = vector.broadcast %cst_37 : f32 to vector<16x16xf32>
    %82 = arith.mulf %80, %81 : vector<16x16xf32>
    %83 = arith.addf %82, %0 : vector<16x16xf32>
    %cst_38 = arith.constant dense<0xFF800000> : vector<16xf32>
    %84 = vector.multi_reduction <maximumf>, %83, %cst_38 [1] : vector<16x16xf32> to vector<16xf32>
    %85 = vector.shape_cast %84 : vector<16xf32> to vector<16x1xf32>
    %86 = vector.broadcast %85 : vector<16x1xf32> to vector<16x16xf32>
    %87 = arith.subf %83, %86 : vector<16x16xf32>
    %88 = math.exp %87 : vector<16x16xf32>
    %cst_39 = arith.constant dense<0.000000e+00> : vector<16xf32>
    %89 = vector.multi_reduction <add>, %88, %cst_39 [1] : vector<16x16xf32> to vector<16xf32>
    %90 = vector.shape_cast %89 : vector<16xf32> to vector<16x1xf32>
    %91 = vector.broadcast %90 : vector<16x1xf32> to vector<16x16xf32>
    %92 = arith.divf %88, %91 : vector<16x16xf32>
    %cst_40 = arith.constant dense<0.000000e+00> : vector<16x32xf32>
    %93 = tpu.matmul %92, %79, %cst_40 {dimension_numbers = #tpu.dot_dimension_numbers<[1], [0], [0], [1], [0, 0, 1, 1], [], []>} : vector<16x16xf32>, vector<16x32xf32>, vector<16x32xf32> -> vector<16x32xf32>
    %94 = vector.extract_strided_slice %42 {offsets = [0, 96], sizes = [16, 32], strides = [1, 1]} : vector<16x384xf32> to vector<16x32xf32>
    %95 = vector.extract_strided_slice %42 {offsets = [0, 224], sizes = [16, 32], strides = [1, 1]} : vector<16x384xf32> to vector<16x32xf32>
    %96 = vector.extract_strided_slice %42 {offsets = [0, 352], sizes = [16, 32], strides = [1, 1]} : vector<16x384xf32> to vector<16x32xf32>
    %cst_41 = arith.constant dense<0.000000e+00> : vector<16x16xf32>
    %97 = tpu.matmul %94, %95, %cst_41 {dimension_numbers = #tpu.dot_dimension_numbers<[1], [1], [0], [0], [0, 0, 1, 0], [], []>} : vector<16x32xf32>, vector<16x32xf32>, vector<16x16xf32> -> vector<16x16xf32>
    %cst_42 = arith.constant 0.176776692 : f32
    %98 = vector.broadcast %cst_42 : f32 to vector<16x16xf32>
    %99 = arith.mulf %97, %98 : vector<16x16xf32>
    %100 = arith.addf %99, %0 : vector<16x16xf32>
    %cst_43 = arith.constant dense<0xFF800000> : vector<16xf32>
    %101 = vector.multi_reduction <maximumf>, %100, %cst_43 [1] : vector<16x16xf32> to vector<16xf32>
    %102 = vector.shape_cast %101 : vector<16xf32> to vector<16x1xf32>
    %103 = vector.broadcast %102 : vector<16x1xf32> to vector<16x16xf32>
    %104 = arith.subf %100, %103 : vector<16x16xf32>
    %105 = math.exp %104 : vector<16x16xf32>
    %cst_44 = arith.constant dense<0.000000e+00> : vector<16xf32>
    %106 = vector.multi_reduction <add>, %105, %cst_44 [1] : vector<16x16xf32> to vector<16xf32>
    %107 = vector.shape_cast %106 : vector<16xf32> to vector<16x1xf32>
    %108 = vector.broadcast %107 : vector<16x1xf32> to vector<16x16xf32>
    %109 = arith.divf %105, %108 : vector<16x16xf32>
    %cst_45 = arith.constant dense<0.000000e+00> : vector<16x32xf32>
    %110 = tpu.matmul %109, %96, %cst_45 {dimension_numbers = #tpu.dot_dimension_numbers<[1], [0], [0], [1], [0, 0, 1, 1], [], []>} : vector<16x16xf32>, vector<16x32xf32>, vector<16x32xf32> -> vector<16x32xf32>
    %111 = tpu.concatenate %59, %76, %93, %110 in 1 : vector<16x32xf32>, vector<16x32xf32>, vector<16x32xf32>, vector<16x32xf32> -> vector<16x128xf32>
    %112 = arith.truncf %111 : vector<16x128xf32> to vector<16x128xbf16>
    %c0_46 = arith.constant 0 : index
    %c0_47 = arith.constant 0 : index
    %c0_48 = arith.constant 0 : index
    %113 = vector.load %arg8[%c0_46, %c0_47, %c0_48] : memref<2x128x128xbf16, #tpu.memory_space<vmem>>, vector<1x128x128xbf16>
    %114 = vector.shape_cast %113 : vector<1x128x128xbf16> to vector<128x128xbf16>
    %cst_49 = arith.constant dense<0.000000e+00> : vector<16x128xf32>
    %115 = tpu.matmul %112, %114, %cst_49 {dimension_numbers = #tpu.dot_dimension_numbers<[1], [0], [0], [1], [0, 0, 1, 1], [], []>} : vector<16x128xbf16>, vector<128x128xbf16>, vector<16x128xf32> -> vector<16x128xf32>
    %c0_50 = arith.constant 0 : index
    %c0_51 = arith.constant 0 : index
    %c0_52 = arith.constant 0 : index
    %116 = vector.load %arg9[%c0_50, %c0_51, %c0_52] : memref<2x1x128xf32, #tpu.memory_space<vmem>>, vector<1x1x128xf32>
    %117 = vector.shape_cast %116 : vector<1x1x128xf32> to vector<1x128xf32>
    %118 = vector.broadcast %117 : vector<1x128xf32> to vector<16x128xf32>
    %119 = arith.addf %115, %118 : vector<16x128xf32>
    %120 = arith.addf %6, %119 : vector<16x128xf32>
    %c0_53 = arith.constant 0 : index
    %c0_54 = arith.constant 0 : index
    %c0_55 = arith.constant 0 : index
    %121 = vector.load %arg10[%c0_53, %c0_54, %c0_55] : memref<2x1x128xf32, #tpu.memory_space<vmem>>, vector<1x1x128xf32>
    %122 = vector.shape_cast %121 : vector<1x1x128xf32> to vector<1x128xf32>
    %c0_56 = arith.constant 0 : index
    %c0_57 = arith.constant 0 : index
    %c0_58 = arith.constant 0 : index
    %123 = vector.load %arg11[%c0_56, %c0_57, %c0_58] : memref<2x1x128xf32, #tpu.memory_space<vmem>>, vector<1x1x128xf32>
    %124 = vector.shape_cast %123 : vector<1x1x128xf32> to vector<1x128xf32>
    %cst_59 = arith.constant dense<0.000000e+00> : vector<16xf32>
    %125 = vector.multi_reduction <add>, %120, %cst_59 [1] : vector<16x128xf32> to vector<16xf32>
    %126 = vector.shape_cast %125 : vector<16xf32> to vector<16x1xf32>
    %127 = arith.mulf %120, %120 : vector<16x128xf32>
    %cst_60 = arith.constant dense<0.000000e+00> : vector<16xf32>
    %128 = vector.multi_reduction <add>, %127, %cst_60 [1] : vector<16x128xf32> to vector<16xf32>
    %129 = vector.shape_cast %128 : vector<16xf32> to vector<16x1xf32>
    %cst_61 = arith.constant 7.812500e-03 : f32
    %130 = vector.broadcast %cst_61 : f32 to vector<16x1xf32>
    %131 = arith.mulf %126, %130 : vector<16x1xf32>
    %cst_62 = arith.constant 7.812500e-03 : f32
    %132 = vector.broadcast %cst_62 : f32 to vector<16x1xf32>
    %133 = arith.mulf %129, %132 : vector<16x1xf32>
    %134 = arith.mulf %131, %131 : vector<16x1xf32>
    %135 = arith.subf %133, %134 : vector<16x1xf32>
    %cst_63 = arith.constant 0.000000e+00 : f32
    %136 = vector.broadcast %cst_63 : f32 to vector<16x1xf32>
    %137 = arith.maximumf %135, %136 : vector<16x1xf32>
    %138 = vector.broadcast %131 : vector<16x1xf32> to vector<16x128xf32>
    %139 = arith.subf %120, %138 : vector<16x128xf32>
    %cst_64 = arith.constant 9.99999996E-13 : f32
    %140 = vector.broadcast %cst_64 : f32 to vector<16x1xf32>
    %141 = arith.addf %137, %140 : vector<16x1xf32>
    %142 = math.rsqrt %141 : vector<16x1xf32>
    %143 = vector.broadcast %142 : vector<16x1xf32> to vector<16x128xf32>
    %144 = arith.mulf %139, %143 : vector<16x128xf32>
    %145 = vector.broadcast %122 : vector<1x128xf32> to vector<16x128xf32>
    %146 = arith.mulf %144, %145 : vector<16x128xf32>
    %147 = vector.broadcast %124 : vector<1x128xf32> to vector<16x128xf32>
    %148 = arith.addf %146, %147 : vector<16x128xf32>
    %149 = arith.truncf %148 : vector<16x128xf32> to vector<16x128xbf16>
    %c0_65 = arith.constant 0 : index
    %c0_66 = arith.constant 0 : index
    %c0_67 = arith.constant 0 : index
    %150 = vector.load %arg12[%c0_65, %c0_66, %c0_67] : memref<2x128x256xbf16, #tpu.memory_space<vmem>>, vector<1x128x256xbf16>
    %151 = vector.shape_cast %150 : vector<1x128x256xbf16> to vector<128x256xbf16>
    %cst_68 = arith.constant dense<0.000000e+00> : vector<16x256xf32>
    %152 = tpu.matmul %149, %151, %cst_68 {dimension_numbers = #tpu.dot_dimension_numbers<[1], [0], [0], [1], [0, 0, 1, 1], [], []>} : vector<16x128xbf16>, vector<128x256xbf16>, vector<16x256xf32> -> vector<16x256xf32>
    %c0_69 = arith.constant 0 : index
    %c0_70 = arith.constant 0 : index
    %c0_71 = arith.constant 0 : index
    %153 = vector.load %arg13[%c0_69, %c0_70, %c0_71] : memref<2x1x256xf32, #tpu.memory_space<vmem>>, vector<1x1x256xf32>
    %154 = vector.shape_cast %153 : vector<1x1x256xf32> to vector<1x256xf32>
    %155 = vector.broadcast %154 : vector<1x256xf32> to vector<16x256xf32>
    %156 = arith.addf %152, %155 : vector<16x256xf32>
    %157 = arith.mulf %156, %156 : vector<16x256xf32>
    %158 = arith.mulf %156, %157 : vector<16x256xf32>
    %cst_72 = arith.constant 4.471500e-02 : f32
    %159 = vector.broadcast %cst_72 : f32 to vector<16x256xf32>
    %160 = arith.mulf %159, %158 : vector<16x256xf32>
    %161 = arith.addf %156, %160 : vector<16x256xf32>
    %cst_73 = arith.constant 0.797884583 : f32
    %162 = vector.broadcast %cst_73 : f32 to vector<16x256xf32>
    %163 = arith.mulf %162, %161 : vector<16x256xf32>
    %164 = math.tanh %163 : vector<16x256xf32>
    %cst_74 = arith.constant 1.000000e+00 : f32
    %165 = vector.broadcast %cst_74 : f32 to vector<16x256xf32>
    %166 = arith.addf %165, %164 : vector<16x256xf32>
    %cst_75 = arith.constant 5.000000e-01 : f32
    %167 = vector.broadcast %cst_75 : f32 to vector<16x256xf32>
    %168 = arith.mulf %167, %166 : vector<16x256xf32>
    %169 = arith.mulf %156, %168 : vector<16x256xf32>
    %170 = arith.truncf %169 : vector<16x256xf32> to vector<16x256xbf16>
    %c0_76 = arith.constant 0 : index
    %c0_77 = arith.constant 0 : index
    %c0_78 = arith.constant 0 : index
    %171 = vector.load %arg14[%c0_76, %c0_77, %c0_78] : memref<2x256x128xbf16, #tpu.memory_space<vmem>>, vector<1x256x128xbf16>
    %172 = vector.shape_cast %171 : vector<1x256x128xbf16> to vector<256x128xbf16>
    %cst_79 = arith.constant dense<0.000000e+00> : vector<16x128xf32>
    %173 = tpu.matmul %170, %172, %cst_79 {dimension_numbers = #tpu.dot_dimension_numbers<[1], [0], [0], [1], [0, 0, 1, 1], [], []>} : vector<16x256xbf16>, vector<256x128xbf16>, vector<16x128xf32> -> vector<16x128xf32>
    %c0_80 = arith.constant 0 : index
    %c0_81 = arith.constant 0 : index
    %c0_82 = arith.constant 0 : index
    %174 = vector.load %arg15[%c0_80, %c0_81, %c0_82] : memref<2x1x128xf32, #tpu.memory_space<vmem>>, vector<1x1x128xf32>
    %175 = vector.shape_cast %174 : vector<1x1x128xf32> to vector<1x128xf32>
    %176 = vector.broadcast %175 : vector<1x128xf32> to vector<16x128xf32>
    %177 = arith.addf %173, %176 : vector<16x128xf32>
    %178 = arith.addf %120, %177 : vector<16x128xf32>
    %c1 = arith.constant 1 : index
    %c0_83 = arith.constant 0 : index
    %c0_84 = arith.constant 0 : index
    %179 = vector.load %arg4[%c1, %c0_83, %c0_84] : memref<2x1x128xf32, #tpu.memory_space<vmem>>, vector<1x1x128xf32>
    %180 = vector.shape_cast %179 : vector<1x1x128xf32> to vector<1x128xf32>
    %c1_85 = arith.constant 1 : index
    %c0_86 = arith.constant 0 : index
    %c0_87 = arith.constant 0 : index
    %181 = vector.load %arg5[%c1_85, %c0_86, %c0_87] : memref<2x1x128xf32, #tpu.memory_space<vmem>>, vector<1x1x128xf32>
    %182 = vector.shape_cast %181 : vector<1x1x128xf32> to vector<1x128xf32>
    %cst_88 = arith.constant dense<0.000000e+00> : vector<16xf32>
    %183 = vector.multi_reduction <add>, %178, %cst_88 [1] : vector<16x128xf32> to vector<16xf32>
    %184 = vector.shape_cast %183 : vector<16xf32> to vector<16x1xf32>
    %185 = arith.mulf %178, %178 : vector<16x128xf32>
    %cst_89 = arith.constant dense<0.000000e+00> : vector<16xf32>
    %186 = vector.multi_reduction <add>, %185, %cst_89 [1] : vector<16x128xf32> to vector<16xf32>
    %187 = vector.shape_cast %186 : vector<16xf32> to vector<16x1xf32>
    %cst_90 = arith.constant 7.812500e-03 : f32
    %188 = vector.broadcast %cst_90 : f32 to vector<16x1xf32>
    %189 = arith.mulf %184, %188 : vector<16x1xf32>
    %cst_91 = arith.constant 7.812500e-03 : f32
    %190 = vector.broadcast %cst_91 : f32 to vector<16x1xf32>
    %191 = arith.mulf %187, %190 : vector<16x1xf32>
    %192 = arith.mulf %189, %189 : vector<16x1xf32>
    %193 = arith.subf %191, %192 : vector<16x1xf32>
    %cst_92 = arith.constant 0.000000e+00 : f32
    %194 = vector.broadcast %cst_92 : f32 to vector<16x1xf32>
    %195 = arith.maximumf %193, %194 : vector<16x1xf32>
    %196 = vector.broadcast %189 : vector<16x1xf32> to vector<16x128xf32>
    %197 = arith.subf %178, %196 : vector<16x128xf32>
    %cst_93 = arith.constant 9.99999996E-13 : f32
    %198 = vector.broadcast %cst_93 : f32 to vector<16x1xf32>
    %199 = arith.addf %195, %198 : vector<16x1xf32>
    %200 = math.rsqrt %199 : vector<16x1xf32>
    %201 = vector.broadcast %200 : vector<16x1xf32> to vector<16x128xf32>
    %202 = arith.mulf %197, %201 : vector<16x128xf32>
    %203 = vector.broadcast %180 : vector<1x128xf32> to vector<16x128xf32>
    %204 = arith.mulf %202, %203 : vector<16x128xf32>
    %205 = vector.broadcast %182 : vector<1x128xf32> to vector<16x128xf32>
    %206 = arith.addf %204, %205 : vector<16x128xf32>
    %207 = arith.truncf %206 : vector<16x128xf32> to vector<16x128xbf16>
    %c1_94 = arith.constant 1 : index
    %c0_95 = arith.constant 0 : index
    %c0_96 = arith.constant 0 : index
    %208 = vector.load %arg6[%c1_94, %c0_95, %c0_96] : memref<2x128x384xbf16, #tpu.memory_space<vmem>>, vector<1x128x384xbf16>
    %209 = vector.shape_cast %208 : vector<1x128x384xbf16> to vector<128x384xbf16>
    %cst_97 = arith.constant dense<0.000000e+00> : vector<16x384xf32>
    %210 = tpu.matmul %207, %209, %cst_97 {dimension_numbers = #tpu.dot_dimension_numbers<[1], [0], [0], [1], [0, 0, 1, 1], [], []>} : vector<16x128xbf16>, vector<128x384xbf16>, vector<16x384xf32> -> vector<16x384xf32>
    %c1_98 = arith.constant 1 : index
    %c0_99 = arith.constant 0 : index
    %c0_100 = arith.constant 0 : index
    %211 = vector.load %arg7[%c1_98, %c0_99, %c0_100] : memref<2x1x384xf32, #tpu.memory_space<vmem>>, vector<1x1x384xf32>
    %212 = vector.shape_cast %211 : vector<1x1x384xf32> to vector<1x384xf32>
    %213 = vector.broadcast %212 : vector<1x384xf32> to vector<16x384xf32>
    %214 = arith.addf %210, %213 : vector<16x384xf32>
    %215 = vector.extract_strided_slice %214 {offsets = [0, 0], sizes = [16, 32], strides = [1, 1]} : vector<16x384xf32> to vector<16x32xf32>
    %216 = vector.extract_strided_slice %214 {offsets = [0, 128], sizes = [16, 32], strides = [1, 1]} : vector<16x384xf32> to vector<16x32xf32>
    %217 = vector.extract_strided_slice %214 {offsets = [0, 256], sizes = [16, 32], strides = [1, 1]} : vector<16x384xf32> to vector<16x32xf32>
    %cst_101 = arith.constant dense<0.000000e+00> : vector<16x16xf32>
    %218 = tpu.matmul %215, %216, %cst_101 {dimension_numbers = #tpu.dot_dimension_numbers<[1], [1], [0], [0], [0, 0, 1, 0], [], []>} : vector<16x32xf32>, vector<16x32xf32>, vector<16x16xf32> -> vector<16x16xf32>
    %cst_102 = arith.constant 0.176776692 : f32
    %219 = vector.broadcast %cst_102 : f32 to vector<16x16xf32>
    %220 = arith.mulf %218, %219 : vector<16x16xf32>
    %221 = arith.addf %220, %0 : vector<16x16xf32>
    %cst_103 = arith.constant dense<0xFF800000> : vector<16xf32>
    %222 = vector.multi_reduction <maximumf>, %221, %cst_103 [1] : vector<16x16xf32> to vector<16xf32>
    %223 = vector.shape_cast %222 : vector<16xf32> to vector<16x1xf32>
    %224 = vector.broadcast %223 : vector<16x1xf32> to vector<16x16xf32>
    %225 = arith.subf %221, %224 : vector<16x16xf32>
    %226 = math.exp %225 : vector<16x16xf32>
    %cst_104 = arith.constant dense<0.000000e+00> : vector<16xf32>
    %227 = vector.multi_reduction <add>, %226, %cst_104 [1] : vector<16x16xf32> to vector<16xf32>
    %228 = vector.shape_cast %227 : vector<16xf32> to vector<16x1xf32>
    %229 = vector.broadcast %228 : vector<16x1xf32> to vector<16x16xf32>
    %230 = arith.divf %226, %229 : vector<16x16xf32>
    %cst_105 = arith.constant dense<0.000000e+00> : vector<16x32xf32>
    %231 = tpu.matmul %230, %217, %cst_105 {dimension_numbers = #tpu.dot_dimension_numbers<[1], [0], [0], [1], [0, 0, 1, 1], [], []>} : vector<16x16xf32>, vector<16x32xf32>, vector<16x32xf32> -> vector<16x32xf32>
    %232 = vector.extract_strided_slice %214 {offsets = [0, 32], sizes = [16, 32], strides = [1, 1]} : vector<16x384xf32> to vector<16x32xf32>
    %233 = vector.extract_strided_slice %214 {offsets = [0, 160], sizes = [16, 32], strides = [1, 1]} : vector<16x384xf32> to vector<16x32xf32>
    %234 = vector.extract_strided_slice %214 {offsets = [0, 288], sizes = [16, 32], strides = [1, 1]} : vector<16x384xf32> to vector<16x32xf32>
    %cst_106 = arith.constant dense<0.000000e+00> : vector<16x16xf32>
    %235 = tpu.matmul %232, %233, %cst_106 {dimension_numbers = #tpu.dot_dimension_numbers<[1], [1], [0], [0], [0, 0, 1, 0], [], []>} : vector<16x32xf32>, vector<16x32xf32>, vector<16x16xf32> -> vector<16x16xf32>
    %cst_107 = arith.constant 0.176776692 : f32
    %236 = vector.broadcast %cst_107 : f32 to vector<16x16xf32>
    %237 = arith.mulf %235, %236 : vector<16x16xf32>
    %238 = arith.addf %237, %0 : vector<16x16xf32>
    %cst_108 = arith.constant dense<0xFF800000> : vector<16xf32>
    %239 = vector.multi_reduction <maximumf>, %238, %cst_108 [1] : vector<16x16xf32> to vector<16xf32>
    %240 = vector.shape_cast %239 : vector<16xf32> to vector<16x1xf32>
    %241 = vector.broadcast %240 : vector<16x1xf32> to vector<16x16xf32>
    %242 = arith.subf %238, %241 : vector<16x16xf32>
    %243 = math.exp %242 : vector<16x16xf32>
    %cst_109 = arith.constant dense<0.000000e+00> : vector<16xf32>
    %244 = vector.multi_reduction <add>, %243, %cst_109 [1] : vector<16x16xf32> to vector<16xf32>
    %245 = vector.shape_cast %244 : vector<16xf32> to vector<16x1xf32>
    %246 = vector.broadcast %245 : vector<16x1xf32> to vector<16x16xf32>
    %247 = arith.divf %243, %246 : vector<16x16xf32>
    %cst_110 = arith.constant dense<0.000000e+00> : vector<16x32xf32>
    %248 = tpu.matmul %247, %234, %cst_110 {dimension_numbers = #tpu.dot_dimension_numbers<[1], [0], [0], [1], [0, 0, 1, 1], [], []>} : vector<16x16xf32>, vector<16x32xf32>, vector<16x32xf32> -> vector<16x32xf32>
    %249 = vector.extract_strided_slice %214 {offsets = [0, 64], sizes = [16, 32], strides = [1, 1]} : vector<16x384xf32> to vector<16x32xf32>
    %250 = vector.extract_strided_slice %214 {offsets = [0, 192], sizes = [16, 32], strides = [1, 1]} : vector<16x384xf32> to vector<16x32xf32>
    %251 = vector.extract_strided_slice %214 {offsets = [0, 320], sizes = [16, 32], strides = [1, 1]} : vector<16x384xf32> to vector<16x32xf32>
    %cst_111 = arith.constant dense<0.000000e+00> : vector<16x16xf32>
    %252 = tpu.matmul %249, %250, %cst_111 {dimension_numbers = #tpu.dot_dimension_numbers<[1], [1], [0], [0], [0, 0, 1, 0], [], []>} : vector<16x32xf32>, vector<16x32xf32>, vector<16x16xf32> -> vector<16x16xf32>
    %cst_112 = arith.constant 0.176776692 : f32
    %253 = vector.broadcast %cst_112 : f32 to vector<16x16xf32>
    %254 = arith.mulf %252, %253 : vector<16x16xf32>
    %255 = arith.addf %254, %0 : vector<16x16xf32>
    %cst_113 = arith.constant dense<0xFF800000> : vector<16xf32>
    %256 = vector.multi_reduction <maximumf>, %255, %cst_113 [1] : vector<16x16xf32> to vector<16xf32>
    %257 = vector.shape_cast %256 : vector<16xf32> to vector<16x1xf32>
    %258 = vector.broadcast %257 : vector<16x1xf32> to vector<16x16xf32>
    %259 = arith.subf %255, %258 : vector<16x16xf32>
    %260 = math.exp %259 : vector<16x16xf32>
    %cst_114 = arith.constant dense<0.000000e+00> : vector<16xf32>
    %261 = vector.multi_reduction <add>, %260, %cst_114 [1] : vector<16x16xf32> to vector<16xf32>
    %262 = vector.shape_cast %261 : vector<16xf32> to vector<16x1xf32>
    %263 = vector.broadcast %262 : vector<16x1xf32> to vector<16x16xf32>
    %264 = arith.divf %260, %263 : vector<16x16xf32>
    %cst_115 = arith.constant dense<0.000000e+00> : vector<16x32xf32>
    %265 = tpu.matmul %264, %251, %cst_115 {dimension_numbers = #tpu.dot_dimension_numbers<[1], [0], [0], [1], [0, 0, 1, 1], [], []>} : vector<16x16xf32>, vector<16x32xf32>, vector<16x32xf32> -> vector<16x32xf32>
    %266 = vector.extract_strided_slice %214 {offsets = [0, 96], sizes = [16, 32], strides = [1, 1]} : vector<16x384xf32> to vector<16x32xf32>
    %267 = vector.extract_strided_slice %214 {offsets = [0, 224], sizes = [16, 32], strides = [1, 1]} : vector<16x384xf32> to vector<16x32xf32>
    %268 = vector.extract_strided_slice %214 {offsets = [0, 352], sizes = [16, 32], strides = [1, 1]} : vector<16x384xf32> to vector<16x32xf32>
    %cst_116 = arith.constant dense<0.000000e+00> : vector<16x16xf32>
    %269 = tpu.matmul %266, %267, %cst_116 {dimension_numbers = #tpu.dot_dimension_numbers<[1], [1], [0], [0], [0, 0, 1, 0], [], []>} : vector<16x32xf32>, vector<16x32xf32>, vector<16x16xf32> -> vector<16x16xf32>
    %cst_117 = arith.constant 0.176776692 : f32
    %270 = vector.broadcast %cst_117 : f32 to vector<16x16xf32>
    %271 = arith.mulf %269, %270 : vector<16x16xf32>
    %272 = arith.addf %271, %0 : vector<16x16xf32>
    %cst_118 = arith.constant dense<0xFF800000> : vector<16xf32>
    %273 = vector.multi_reduction <maximumf>, %272, %cst_118 [1] : vector<16x16xf32> to vector<16xf32>
    %274 = vector.shape_cast %273 : vector<16xf32> to vector<16x1xf32>
    %275 = vector.broadcast %274 : vector<16x1xf32> to vector<16x16xf32>
    %276 = arith.subf %272, %275 : vector<16x16xf32>
    %277 = math.exp %276 : vector<16x16xf32>
    %cst_119 = arith.constant dense<0.000000e+00> : vector<16xf32>
    %278 = vector.multi_reduction <add>, %277, %cst_119 [1] : vector<16x16xf32> to vector<16xf32>
    %279 = vector.shape_cast %278 : vector<16xf32> to vector<16x1xf32>
    %280 = vector.broadcast %279 : vector<16x1xf32> to vector<16x16xf32>
    %281 = arith.divf %277, %280 : vector<16x16xf32>
    %cst_120 = arith.constant dense<0.000000e+00> : vector<16x32xf32>
    %282 = tpu.matmul %281, %268, %cst_120 {dimension_numbers = #tpu.dot_dimension_numbers<[1], [0], [0], [1], [0, 0, 1, 1], [], []>} : vector<16x16xf32>, vector<16x32xf32>, vector<16x32xf32> -> vector<16x32xf32>
    %283 = tpu.concatenate %231, %248, %265, %282 in 1 : vector<16x32xf32>, vector<16x32xf32>, vector<16x32xf32>, vector<16x32xf32> -> vector<16x128xf32>
    %284 = arith.truncf %283 : vector<16x128xf32> to vector<16x128xbf16>
    %c1_121 = arith.constant 1 : index
    %c0_122 = arith.constant 0 : index
    %c0_123 = arith.constant 0 : index
    %285 = vector.load %arg8[%c1_121, %c0_122, %c0_123] : memref<2x128x128xbf16, #tpu.memory_space<vmem>>, vector<1x128x128xbf16>
    %286 = vector.shape_cast %285 : vector<1x128x128xbf16> to vector<128x128xbf16>
    %cst_124 = arith.constant dense<0.000000e+00> : vector<16x128xf32>
    %287 = tpu.matmul %284, %286, %cst_124 {dimension_numbers = #tpu.dot_dimension_numbers<[1], [0], [0], [1], [0, 0, 1, 1], [], []>} : vector<16x128xbf16>, vector<128x128xbf16>, vector<16x128xf32> -> vector<16x128xf32>
    %c1_125 = arith.constant 1 : index
    %c0_126 = arith.constant 0 : index
    %c0_127 = arith.constant 0 : index
    %288 = vector.load %arg9[%c1_125, %c0_126, %c0_127] : memref<2x1x128xf32, #tpu.memory_space<vmem>>, vector<1x1x128xf32>
    %289 = vector.shape_cast %288 : vector<1x1x128xf32> to vector<1x128xf32>
    %290 = vector.broadcast %289 : vector<1x128xf32> to vector<16x128xf32>
    %291 = arith.addf %287, %290 : vector<16x128xf32>
    %292 = arith.addf %178, %291 : vector<16x128xf32>
    %c1_128 = arith.constant 1 : index
    %c0_129 = arith.constant 0 : index
    %c0_130 = arith.constant 0 : index
    %293 = vector.load %arg10[%c1_128, %c0_129, %c0_130] : memref<2x1x128xf32, #tpu.memory_space<vmem>>, vector<1x1x128xf32>
    %294 = vector.shape_cast %293 : vector<1x1x128xf32> to vector<1x128xf32>
    %c1_131 = arith.constant 1 : index
    %c0_132 = arith.constant 0 : index
    %c0_133 = arith.constant 0 : index
    %295 = vector.load %arg11[%c1_131, %c0_132, %c0_133] : memref<2x1x128xf32, #tpu.memory_space<vmem>>, vector<1x1x128xf32>
    %296 = vector.shape_cast %295 : vector<1x1x128xf32> to vector<1x128xf32>
    %cst_134 = arith.constant dense<0.000000e+00> : vector<16xf32>
    %297 = vector.multi_reduction <add>, %292, %cst_134 [1] : vector<16x128xf32> to vector<16xf32>
    %298 = vector.shape_cast %297 : vector<16xf32> to vector<16x1xf32>
    %299 = arith.mulf %292, %292 : vector<16x128xf32>
    %cst_135 = arith.constant dense<0.000000e+00> : vector<16xf32>
    %300 = vector.multi_reduction <add>, %299, %cst_135 [1] : vector<16x128xf32> to vector<16xf32>
    %301 = vector.shape_cast %300 : vector<16xf32> to vector<16x1xf32>
    %cst_136 = arith.constant 7.812500e-03 : f32
    %302 = vector.broadcast %cst_136 : f32 to vector<16x1xf32>
    %303 = arith.mulf %298, %302 : vector<16x1xf32>
    %cst_137 = arith.constant 7.812500e-03 : f32
    %304 = vector.broadcast %cst_137 : f32 to vector<16x1xf32>
    %305 = arith.mulf %301, %304 : vector<16x1xf32>
    %306 = arith.mulf %303, %303 : vector<16x1xf32>
    %307 = arith.subf %305, %306 : vector<16x1xf32>
    %cst_138 = arith.constant 0.000000e+00 : f32
    %308 = vector.broadcast %cst_138 : f32 to vector<16x1xf32>
    %309 = arith.maximumf %307, %308 : vector<16x1xf32>
    %310 = vector.broadcast %303 : vector<16x1xf32> to vector<16x128xf32>
    %311 = arith.subf %292, %310 : vector<16x128xf32>
    %cst_139 = arith.constant 9.99999996E-13 : f32
    %312 = vector.broadcast %cst_139 : f32 to vector<16x1xf32>
    %313 = arith.addf %309, %312 : vector<16x1xf32>
    %314 = math.rsqrt %313 : vector<16x1xf32>
    %315 = vector.broadcast %314 : vector<16x1xf32> to vector<16x128xf32>
    %316 = arith.mulf %311, %315 : vector<16x128xf32>
    %317 = vector.broadcast %294 : vector<1x128xf32> to vector<16x128xf32>
    %318 = arith.mulf %316, %317 : vector<16x128xf32>
    %319 = vector.broadcast %296 : vector<1x128xf32> to vector<16x128xf32>
    %320 = arith.addf %318, %319 : vector<16x128xf32>
    %321 = arith.truncf %320 : vector<16x128xf32> to vector<16x128xbf16>
    %c1_140 = arith.constant 1 : index
    %c0_141 = arith.constant 0 : index
    %c0_142 = arith.constant 0 : index
    %322 = vector.load %arg12[%c1_140, %c0_141, %c0_142] : memref<2x128x256xbf16, #tpu.memory_space<vmem>>, vector<1x128x256xbf16>
    %323 = vector.shape_cast %322 : vector<1x128x256xbf16> to vector<128x256xbf16>
    %cst_143 = arith.constant dense<0.000000e+00> : vector<16x256xf32>
    %324 = tpu.matmul %321, %323, %cst_143 {dimension_numbers = #tpu.dot_dimension_numbers<[1], [0], [0], [1], [0, 0, 1, 1], [], []>} : vector<16x128xbf16>, vector<128x256xbf16>, vector<16x256xf32> -> vector<16x256xf32>
    %c1_144 = arith.constant 1 : index
    %c0_145 = arith.constant 0 : index
    %c0_146 = arith.constant 0 : index
    %325 = vector.load %arg13[%c1_144, %c0_145, %c0_146] : memref<2x1x256xf32, #tpu.memory_space<vmem>>, vector<1x1x256xf32>
    %326 = vector.shape_cast %325 : vector<1x1x256xf32> to vector<1x256xf32>
    %327 = vector.broadcast %326 : vector<1x256xf32> to vector<16x256xf32>
    %328 = arith.addf %324, %327 : vector<16x256xf32>
    %329 = arith.mulf %328, %328 : vector<16x256xf32>
    %330 = arith.mulf %328, %329 : vector<16x256xf32>
    %cst_147 = arith.constant 4.471500e-02 : f32
    %331 = vector.broadcast %cst_147 : f32 to vector<16x256xf32>
    %332 = arith.mulf %331, %330 : vector<16x256xf32>
    %333 = arith.addf %328, %332 : vector<16x256xf32>
    %cst_148 = arith.constant 0.797884583 : f32
    %334 = vector.broadcast %cst_148 : f32 to vector<16x256xf32>
    %335 = arith.mulf %334, %333 : vector<16x256xf32>
    %336 = math.tanh %335 : vector<16x256xf32>
    %cst_149 = arith.constant 1.000000e+00 : f32
    %337 = vector.broadcast %cst_149 : f32 to vector<16x256xf32>
    %338 = arith.addf %337, %336 : vector<16x256xf32>
    %cst_150 = arith.constant 5.000000e-01 : f32
    %339 = vector.broadcast %cst_150 : f32 to vector<16x256xf32>
    %340 = arith.mulf %339, %338 : vector<16x256xf32>
    %341 = arith.mulf %328, %340 : vector<16x256xf32>
    %342 = arith.truncf %341 : vector<16x256xf32> to vector<16x256xbf16>
    %c1_151 = arith.constant 1 : index
    %c0_152 = arith.constant 0 : index
    %c0_153 = arith.constant 0 : index
    %343 = vector.load %arg14[%c1_151, %c0_152, %c0_153] : memref<2x256x128xbf16, #tpu.memory_space<vmem>>, vector<1x256x128xbf16>
    %344 = vector.shape_cast %343 : vector<1x256x128xbf16> to vector<256x128xbf16>
    %cst_154 = arith.constant dense<0.000000e+00> : vector<16x128xf32>
    %345 = tpu.matmul %342, %344, %cst_154 {dimension_numbers = #tpu.dot_dimension_numbers<[1], [0], [0], [1], [0, 0, 1, 1], [], []>} : vector<16x256xbf16>, vector<256x128xbf16>, vector<16x128xf32> -> vector<16x128xf32>
    %c1_155 = arith.constant 1 : index
    %c0_156 = arith.constant 0 : index
    %c0_157 = arith.constant 0 : index
    %346 = vector.load %arg15[%c1_155, %c0_156, %c0_157] : memref<2x1x128xf32, #tpu.memory_space<vmem>>, vector<1x1x128xf32>
    %347 = vector.shape_cast %346 : vector<1x1x128xf32> to vector<1x128xf32>
    %348 = vector.broadcast %347 : vector<1x128xf32> to vector<16x128xf32>
    %349 = arith.addf %345, %348 : vector<16x128xf32>
    %350 = arith.addf %292, %349 : vector<16x128xf32>
    %c0_158 = arith.constant 0 : index
    %c0_159 = arith.constant 0 : index
    %351 = vector.load %arg16[%c0_158, %c0_159] : memref<1x128xf32, #tpu.memory_space<vmem>>, vector<1x128xf32>
    %c0_160 = arith.constant 0 : index
    %c0_161 = arith.constant 0 : index
    %352 = vector.load %arg17[%c0_160, %c0_161] : memref<1x128xf32, #tpu.memory_space<vmem>>, vector<1x128xf32>
    %cst_162 = arith.constant dense<0.000000e+00> : vector<16xf32>
    %353 = vector.multi_reduction <add>, %350, %cst_162 [1] : vector<16x128xf32> to vector<16xf32>
    %354 = vector.shape_cast %353 : vector<16xf32> to vector<16x1xf32>
    %355 = arith.mulf %350, %350 : vector<16x128xf32>
    %cst_163 = arith.constant dense<0.000000e+00> : vector<16xf32>
    %356 = vector.multi_reduction <add>, %355, %cst_163 [1] : vector<16x128xf32> to vector<16xf32>
    %357 = vector.shape_cast %356 : vector<16xf32> to vector<16x1xf32>
    %cst_164 = arith.constant 7.812500e-03 : f32
    %358 = vector.broadcast %cst_164 : f32 to vector<16x1xf32>
    %359 = arith.mulf %354, %358 : vector<16x1xf32>
    %cst_165 = arith.constant 7.812500e-03 : f32
    %360 = vector.broadcast %cst_165 : f32 to vector<16x1xf32>
    %361 = arith.mulf %357, %360 : vector<16x1xf32>
    %362 = arith.mulf %359, %359 : vector<16x1xf32>
    %363 = arith.subf %361, %362 : vector<16x1xf32>
    %cst_166 = arith.constant 0.000000e+00 : f32
    %364 = vector.broadcast %cst_166 : f32 to vector<16x1xf32>
    %365 = arith.maximumf %363, %364 : vector<16x1xf32>
    %366 = vector.broadcast %359 : vector<16x1xf32> to vector<16x128xf32>
    %367 = arith.subf %350, %366 : vector<16x128xf32>
    %cst_167 = arith.constant 9.99999996E-13 : f32
    %368 = vector.broadcast %cst_167 : f32 to vector<16x1xf32>
    %369 = arith.addf %365, %368 : vector<16x1xf32>
    %370 = math.rsqrt %369 : vector<16x1xf32>
    %371 = vector.broadcast %370 : vector<16x1xf32> to vector<16x128xf32>
    %372 = arith.mulf %367, %371 : vector<16x128xf32>
    %373 = vector.broadcast %351 : vector<1x128xf32> to vector<16x128xf32>
    %374 = arith.mulf %372, %373 : vector<16x128xf32>
    %375 = vector.broadcast %352 : vector<1x128xf32> to vector<16x128xf32>
    %376 = arith.addf %374, %375 : vector<16x128xf32>
    %377 = arith.truncf %376 : vector<16x128xf32> to vector<16x128xbf16>
    %c0_168 = arith.constant 0 : index
    %c0_169 = arith.constant 0 : index
    %378 = vector.load %arg18[%c0_168, %c0_169] : memref<128x128xbf16, #tpu.memory_space<vmem>>, vector<128x128xbf16>
    %cst_170 = arith.constant dense<0.000000e+00> : vector<16x128xf32>
    %379 = tpu.matmul %377, %378, %cst_170 {dimension_numbers = #tpu.dot_dimension_numbers<[1], [0], [0], [1], [0, 0, 1, 1], [], []>} : vector<16x128xbf16>, vector<128x128xbf16>, vector<16x128xf32> -> vector<16x128xf32>
    %c0_171 = arith.constant 0 : index
    %c0_172 = arith.constant 0 : index
    %380 = vector.load %arg19[%c0_171, %c0_172] : memref<1x128xf32, #tpu.memory_space<vmem>>, vector<1x128xf32>
    %381 = vector.broadcast %380 : vector<1x128xf32> to vector<16x128xf32>
    %382 = arith.addf %379, %381 : vector<16x128xf32>
    %c0_173 = arith.constant 0 : index
    %c0_174 = arith.constant 0 : index
    %383 = vector.load %arg20[%c0_173, %c0_174] : memref<16x128xf32, #tpu.memory_space<vmem>>, vector<16x128xf32>
    tpu.vector_store %arg20[%c0_173, %c0_174], %382 {strides = array<i32>} : memref<16x128xf32, #tpu.memory_space<vmem>>, vector<16x128xf32>,
    %384 = tpu.concatenate %58, %75, %92, %109, %230, %247, %264, %281 in 1 : vector<16x16xf32>, vector<16x16xf32>, vector<16x16xf32>, vector<16x16xf32>, vector<16x16xf32>, vector<16x16xf32>, vector<16x16xf32>, vector<16x16xf32> -> vector<16x128xf32>
    %c0_175 = arith.constant 0 : index
    %c0_176 = arith.constant 0 : index
    %385 = vector.load %arg21[%c0_175, %c0_176] : memref<16x128xf32, #tpu.memory_space<vmem>>, vector<16x128xf32>
    tpu.vector_store %arg21[%c0_175, %c0_176], %384 {strides = array<i32>} : memref<16x128xf32, #tpu.memory_space<vmem>>, vector<16x128xf32>,
    return
  }
}

</mosaic_0001>

<bundles_post_ra>
// kernel: mae_classifier_forward.1
= control target key start
LH: loop header
LB: loop body
LE: loop exit
PB: predicated region body
PF: predicated region fallthrough
CT: control target
= control target key end

     0   :  { %v4939_v0 = vmov 0.0   ;;  %vm4940_vm0 = vmmov 0   ;;  %v4941_v42 = vmov 0   ;;  %vm488_vm1 = vcmask 261120   ;;  %s4942_s27 = smov 96   ;;  %s6045_s3 = inlined_call_operand.vmem [shape: bf16[128,128], index: 3, kind: input, shape index: {}]   ;;  %s6046_s0 = inlined_call_operand.vmem [shape: f32[16,128], index: 0, kind: input, shape index: {}]   ;;  %s6047_s1 = inlined_call_operand.vmem [shape: f32[16,128], index: 1, kind: input, shape index: {}]   ;;  %s6048_s6 = inlined_call_operand.vmem [shape: bf16[2,128,384], index: 6, kind: input, shape index: {}]   ;;  %s6049_s4 = inlined_call_operand.vmem [shape: f32[2,1,128], index: 4, kind: input, shape index: {}]   ;;  %s6050_s5 = inlined_call_operand.vmem [shape: f32[2,1,128], index: 5, kind: input, shape index: {}]   ;;  %s6051_s7 = inlined_call_operand.vmem [shape: f32[2,1,384], index: 7, kind: input, shape index: {}]   ;;  %s6052_s2 = inlined_call_operand.vmem [shape: f32[16,16], index: 2, kind: input, shape index: {}]   ;;  %s6053_s8 = inlined_call_operand.vmem [shape: bf16[2,128,128], index: 8, kind: input, shape index: {}]   ;;  %s6054_s9 = inlined_call_operand.vmem [shape: f32[2,1,128], index: 9, kind: input, shape index: {}]   ;;  %s6055_s12 = inlined_call_operand.vmem [shape: bf16[2,128,256], index: 12, kind: input, shape index: {}]   ;;  %s6056_s10 = inlined_call_operand.vmem [shape: f32[2,1,128], index: 10, kind: input, shape index: {}]   ;;  %s6057_s11 = inlined_call_operand.vmem [shape: f32[2,1,128], index: 11, kind: input, shape index: {}]   ;;  %s6058_s14 = inlined_call_operand.vmem [shape: bf16[2,256,128], index: 14, kind: input, shape index: {}]   ;;  %s6059_s13 = inlined_call_operand.vmem [shape: f32[2,1,256], index: 13, kind: input, shape index: {}]   ;;  %s6060_s15 = inlined_call_operand.vmem [shape: f32[2,1,128], index: 15, kind: input, shape index: {}]   ;;  %s6061_s18 = inlined_call_operand.vmem [shape: bf16[128,128], index: 18, kind: input, shape index: {}]   ;;  %s6062_s16 = inlined_call_operand.vmem [shape: f32[1,128], index: 16, kind: input, shape index: {}]   ;;  %s6063_s17 = inlined_call_operand.vmem [shape: f32[1,128], index: 17, kind: input, shape index: {}]   ;;  %s6064_s21 = inlined_call_operand.vmem [shape: f32[16,128], index: 21, kind: output, shape index: {1}]   ;;  %s6065_s19 = inlined_call_operand.vmem [shape: f32[1,128], index: 19, kind: input, shape index: {}]   ;;  %s6066_s20 = inlined_call_operand.vmem [shape: f32[16,128], index: 20, kind: output, shape index: {0}]  }
   0x1   :  { %6075 = sst [smem:[#allocation2_spill]] %s6045_s3  ;;  %4249 = vmatprep.subr.bf16.mxu0 %v4939_v0  ;;  %4265 = vmatprep.mubr.msk.bf16.mxu0 %vm4940_vm0, %v4939_v0  ;;  %vm5228_vm2 = vmpackc.low %vm488_vm1, %vm488_vm1  ;;  %vm580_vm3 = vcmask 130048   ;;  %vm1324_vm4 = vcmask 523264   ;;  %vm1327_vm5 = vcmask 785408   ;;  %vm3753_vm6 = vcmask 392192  }
   0x2   :  { %6076 = sst [smem:[#allocation3_spill]] %s6046_s0  ;;  %s6081_s26 = sld [smem:[#allocation2_spill]]  ;;  %436 = vmatprep.mubr.bf16.mxu1 %v4941_v42  ;;  %vm3758_vm7 = vcmask 654336   ;;  %vm3763_vm8 = vcmask 916480  }
   0x3   :  { %6077 = sst [smem:[#allocation4_spill]] %s6047_s1  ;;  %s6082_s28 = sld [smem:[#allocation3_spill]] }
   0x4   :  { %6078 = sst [smem:[#allocation5_spill]] %s6048_s6  ;;  %s6083_s30 = sld [smem:[#allocation4_spill]] }
   0x5   :  { %6079 = sst [smem:[#allocation6_spill]] %s6049_s4  ;;  %s6084_s24 = sld [smem:[#allocation5_spill]] }
   0x6   :  { %6080 = sst [smem:[#allocation7_spill]] %s6050_s5  ;;  %s6085_s3 = sld [smem:[#allocation6_spill]] }
   0x7   :  { %s6073_s6 = smov 32   ;;  %s4946_s5 = smov 48  }
   0x8   :  { %v4661_v1 = vld [vmem:[%s6081_s26] sm:$0xff]   ;;  %v4662_v2 = vld [vmem:[%s6081_s26 + $0x8] sm:$0xff]   ;;  %v4663_v3 = vld [vmem:[%s6081_s26 + $0x10] sm:$0xff]  }
   0x9   :  { %4250 = vmatpush3.bf16.msra.mxu0 %v4661_v1  ;;  %v4664_v4 = vld [vmem:[%s6081_s26 + $0x18] sm:$0xff]   ;;  %v4665_v5 = vld [vmem:[%s6081_s26 + $0x20] sm:$0xff]   ;;  %v4666_v6 = vld [vmem:[%s6081_s26 + $0x28] sm:$0xff]  }
   0xa   :  { %4251 = vmatprep.subr.bf16.mxu0 %v4939_v0  ;;  %v4667_v7 = vld [vmem:[%s6081_s26 + $0x30] sm:$0xff]   ;;  %v4668_v8 = vld [vmem:[%s6081_s26 + $0x38] sm:$0xff]   ;;  %v70_v9 = vld [vmem:[%s6082_s28] sm:$0xff] }
   0xb   :  { %v71_v10 = vld [vmem:[%s6082_s28 + $0x8] sm:$0xff]  ;;  %v89_v12 = vld [vmem:[%s6083_s30] sm:$0xff]  ;;  %v4679_v29 = vld [vmem:[%s6084_s24 + $0x30] ss:$12 sps:$4 sm:$0xff]   ;;  %s4944_s28 = smov 64  }
   0xc   :  { %v72_v11 = vpack.c.bf16 %v71_v10, %v70_v9  ;;  %v90_v14 = vld [vmem:[%s6083_s30 + $0x8] sm:$0xff]  ;;  %v4669_v22 = vld [vmem:[%s6084_s24 + $0x4] ss:$12 sps:$4 sm:$0xff]   ;;  %v4677_v28 = vld [vmem:[%s6084_s24 + $0x34] ss:$12 sps:$4 sm:$0xff]   ;;  %s6086_s30 = sld [smem:[#allocation7_spill]] }
   0xd   :  { %4252 = vmatpush3.bf16.msra.mxu0 %v4662_v2  ;;  %v4671_v23 = vld [vmem:[%s6084_s24] ss:$12 sps:$4 sm:$0xff]   ;;  %404 = vmatprep.subr.bf16.mxu1 %v4669_v22  ;;  %v4672_v24 = vld [vmem:[%s6084_s24 + $0x8] ss:$12 sps:$4 sm:$0xff]   ;;  %v4675_v26 = vld [vmem:[%s6084_s24 + $0x18] ss:$12 sps:$4 sm:$0xff]  }
   0xe   :  { %4253 = vmatprep.subr.bf16.mxu0 %v4939_v0  ;;  %405 = vmatpush1.bf16.msra.mxu1 %v4671_v23  ;;  %v4673_v25 = vld [vmem:[%s6084_s24 + $0x1c] ss:$12 sps:$4 sm:$0xff]   ;;  %v4676_v27 = vld [vmem:[%s6084_s24 + $0x20] ss:$12 sps:$4 sm:$0xff]   ;;  %v4680_v30 = vld [vmem:[%s6084_s24 + $0x38] ss:$12 sps:$4 sm:$0xff]  }
   0xf   :  { %406 = vmatprep.subr.bf16.mxu1 %v4673_v25  ;;  %v4681_v31 = vld [vmem:[%s6084_s24 + $0x4c] ss:$12 sps:$4 sm:$0xff]   ;;  %v4683_v32 = vld [vmem:[%s6084_s24 + $0x48] ss:$12 sps:$4 sm:$0xff]   ;;  %v4684_v33 = vld [vmem:[%s6084_s24 + $0x50] ss:$12 sps:$4 sm:$0xff]  }
  0x10   :  { %v4685_v34 = vld [vmem:[%s6084_s24 + $0x64] ss:$12 sps:$4 sm:$0xff]   ;;  %v4687_v35 = vld [vmem:[%s6084_s24 + $0x60] ss:$12 sps:$4 sm:$0xff]   ;;  %v4688_v36 = vld [vmem:[%s6084_s24 + $0x68] ss:$12 sps:$4 sm:$0xff]  }
  0x11   :  { %4254 = vmatpush3.bf16.msra.mxu0 %v4663_v3  ;;  %v4689_v37 = vld [vmem:[%s6084_s24 + $0x7c] ss:$12 sps:$4 sm:$0xff]   ;;  %v4691_v38 = vld [vmem:[%s6084_s24 + $0x78] ss:$12 sps:$4 sm:$0xff]   ;;  %v4692_v39 = vld [vmem:[%s6084_s24 + $0x80] ss:$12 sps:$4 sm:$0xff]  }
  0x12   :  { %4255 = vmatprep.subr.bf16.mxu0 %v4939_v0  ;;  %407 = vmatpush1.bf16.msra.mxu1 %v4675_v26  ;;  %v4693_v40 = vld [vmem:[%s6084_s24 + $0x94] ss:$12 sps:$4 sm:$0xff]   ;;  %v4695_v41 = vld [vmem:[%s6084_s24 + $0x90] ss:$12 sps:$4 sm:$0xff]   ;;  %v4696_v43 = vld [vmem:[%s6084_s24 + $0x98] ss:$12 sps:$4 sm:$0xff]  }
  0x13   :  { %408 = vmatprep.subr.bf16.mxu1 %v4677_v28  ;;  %v4697_v44 = vld [vmem:[%s6084_s24 + $0xac] ss:$12 sps:$4 sm:$0xff]   ;;  %v4699_v45 = vld [vmem:[%s6084_s24 + $0xa8] ss:$12 sps:$4 sm:$0xff]   ;;  %v4700_v46 = vld [vmem:[%s6084_s24 + $0xb0] ss:$12 sps:$4 sm:$0xff]  }
  0x14   :  { %v3784_v3 = vld [vmem:[%s6085_s3] ss:$0 sm:$0xff] }
  0x15   :  { %4256 = vmatpush3.bf16.msra.mxu0 %v4664_v4 }
  0x16   :  { %4257 = vmatprep.subr.bf16.mxu0 %v4939_v0  ;;  %409 = vmatpush1.bf16.msra.mxu1 %v4679_v29 }
  0x17   :  { %410 = vmatprep.subr.bf16.mxu1 %v4681_v31 }
  0x19   :  { %4258 = vmatpush3.bf16.msra.mxu0 %v4665_v5 }
  0x1a   :  { %4259 = vmatprep.subr.bf16.mxu0 %v4939_v0  ;;  %411 = vmatpush1.bf16.msra.mxu1 %v4683_v32 }
  0x1b   :  { %412 = vmatprep.subr.bf16.mxu1 %v4685_v34 }
  0x1d   :  { %4260 = vmatpush3.bf16.msra.mxu0 %v4666_v6 }
  0x1e   :  { %4261 = vmatprep.subr.bf16.mxu0 %v4939_v0  ;;  %413 = vmatpush1.bf16.msra.mxu1 %v4687_v35 }
  0x1f   :  { %414 = vmatprep.subr.bf16.mxu1 %v4689_v37 }
  0x21   :  { %4262 = vmatpush3.bf16.msra.mxu0 %v4667_v7 }
  0x22   :  { %4263 = vmatprep.subr.bf16.mxu0 %v4939_v0  ;;  %415 = vmatpush1.bf16.msra.mxu1 %v4691_v38 }
  0x23   :  { %416 = vmatprep.subr.bf16.mxu1 %v4693_v40 }
  0x25   :  { %4264 = vmatpush3.bf16.msra.mxu0 %v4668_v8  ;;  %v3785_v8 = vld [vmem:[%s6086_s30] ss:$0 sm:$0xff] }
  0x26   :  { %4269 = vmatprep.subr.bf16.mxu0 %v4939_v0  ;;  %417 = vmatpush1.bf16.msra.mxu1 %v4695_v41 }
  0x27   :  { %418 = vmatprep.subr.bf16.mxu1 %v4697_v44 }
  0x28   :  { %4266 = vmatmul.mubr.bf16.vlgmr.msra.gmra.mrb[0].mxu0 %v72_v11 }
  0x29   :  { %4285 = vmatprep.mubr.msk.bf16.mxu0 %vm4940_vm0, %v4939_v0  ;;  %4270 = vmatpush3.bf16.msra.mxu0 %v4672_v24 }
  0x2a   :  { %4271 = vmatprep.subr.bf16.mxu0 %v4939_v0  ;;  %419 = vmatpush1.bf16.msra.mxu1 %v4699_v45  ;;  %v5247_v45 = vld [vmem:[%s6052_s2 + $0x8] sm:$0xff] }
  0x2d   :  { %4272 = vmatpush3.bf16.msra.mxu0 %v4676_v27 }
  0x2e   :  { %4273 = vmatprep.subr.bf16.mxu0 %v4939_v0 }
  0x31   :  { %4274 = vmatpush3.bf16.msra.mxu0 %v4680_v30 }
  0x32   :  { %4275 = vmatprep.subr.bf16.mxu0 %v4939_v0 }
  0x35   :  { %4276 = vmatpush3.bf16.msra.mxu0 %v4684_v33 }
  0x36   :  { %4277 = vmatprep.subr.bf16.mxu0 %v4939_v0 }
  0x39   :  { %4278 = vmatpush3.bf16.msra.mxu0 %v4688_v36 }
  0x3a   :  { %4279 = vmatprep.subr.bf16.mxu0 %v4939_v0 }
  0x3d   :  { %4280 = vmatpush3.bf16.msra.mxu0 %v4692_v39 }
  0x3e   :  { %4281 = vmatprep.subr.bf16.mxu0 %v4939_v0 }
  0x41   :  { %4282 = vmatpush3.bf16.msra.mxu0 %v4696_v43 }
  0x42   :  { %4283 = vmatprep.subr.bf16.mxu0 %v4939_v0 }
  0x45   :  { %4284 = vmatpush3.bf16.msra.mxu0 %v4700_v46 }
  0xfb   :  { %v173_v13 = vpop.f32.mrb[0].mxu0 }
  0xfc   :  { %v5108_v15 = vadd.f32 %v173_v13, %v89_v12  ;;  %v4267_v16 = vpop.f32.mrb[1].mxu0  ;;  %v261_v13 = vlaneseq }
  0xfd   :  { %v176_v17 = vpop.f32.mrb[2].mxu0 }
  0xfe   :  { %v5110_v18 = vadd.f32 %v176_v17, %v90_v14  ;;  %182 = vadd.xlane.f32.xlu0 %v5108_v15  ;;  %v4268_v19 = vpop.f32.mrb[3].mxu0  ;;  %v186_v20 = vmul.f32 %v5108_v15, %v5108_v15  ;;  %v5206_v14 = vshrl.u32 %v261_v13, 7  ;;  %v259_v17 = vld [vmem:[%s6051_s7] sm:$0x7] }
 0x100   :  { %188 = vadd.xlane.f32.xlu1 %v186_v20  ;;  %v187_v21 = vmul.f32 %v5110_v18, %v5110_v18  ;;  %v5209_v16 = vsub.s32 0, %v5206_v14  ;;  %v271_v19 = vsub.s32 2, %v5206_v14  ;;  %v5216_v20 = vsub.s32 1, %v5206_v14 }
 0x102   :  { %184 = vadd.xlane.f32.xlu0 %v5110_v18  ;;  %v272_v22 = vrot.slane %v259_v17, %v271_v19  ;;  %v268_v25 = vrot.slane %v259_v17, %v5216_v20 }
 0x104   :  { %190 = vadd.xlane.f32.xlu1 %v187_v21  ;;  %v264_v21 = vrot.slane %v259_v17, %v5209_v16 }
 0x18b   :  { %v183_v47 = vpop.xlane.xlu0 %182 }
 0x18c   :  { %v192_v48 = vmul.f32 0.0078125, %v183_v47 }
 0x18d   :  { %v189_v49 = vpop.xlane.xlu1 %188 }
 0x18e   :  { %v196_v50 = vmul.f32 %v192_v48, %v192_v48  ;;  %v194_v51 = vmul.f32 0.0078125, %v189_v49  ;;  %v202_v63 = vsub.f32 %v5108_v15, %v192_v48  ;;  %v5252_v48 = vld [vmem:[%s6052_s2] sm:$0xff] }
 0x18f   :  { %v185_v52 = vpop.xlane.xlu0 %184 }
 0x190   :  { %v198_v53 = vsub.f32 %v194_v51, %v196_v50  ;;  %v193_v54 = vmul.f32 0.0078125, %v185_v52 }
 0x191   :  { %v191_v55 = vpop.xlane.xlu1 %190 }
 0x192   :  { %v200_v56 = vmax.f32 %v198_v53, 0.0  ;;  %v197_v57 = vmul.f32 %v193_v54, %v193_v54  ;;  %v195_v58 = vmul.f32 0.0078125, %v191_v55  ;;  %v203_v4 = vsub.f32 %v5110_v18, %v193_v54 }
 0x194   :  { %v204_v59 = vadd.f32 1e-12, %v200_v56  ;;  %v199_v60 = vsub.f32 %v195_v58, %v197_v57 }
 0x196   :  { %4837 = vrsqrt.f32 %v204_v59  ;;  %v201_v61 = vmax.f32 %v199_v60, 0.0 }
 0x198   :  { %v205_v62 = vadd.f32 1e-12, %v201_v61 }
 0x19a   :  { %4839 = vrsqrt.f32 %v205_v62 }
 0x1a0   :  { %v4838_v1 = vpop.eup %4837 }
 0x1a1   :  { %v208_v2 = vmul.f32 %v4838_v1, %v202_v63 }
 0x1a3   :  { %v216_v7 = vmul.f32 %v3784_v3, %v208_v2 }
 0x1a4   :  { %v4840_v5 = vpop.eup %4839 }
 0x1a5   :  { %v209_v6 = vmul.f32 %v4840_v5, %v203_v4  ;;  %v224_v10 = vadd.f32 %v3785_v8, %v216_v7 }
 0x1a7   :  { %v217_v9 = vmul.f32 %v3784_v3, %v209_v6 }
 0x1a9   :  { %v225_v11 = vadd.f32 %v3785_v8, %v217_v9 }
 0x1ab   :  { %v226_v12 = vpack.c.bf16 %v225_v11, %v224_v10 }
 0x1ad   :  { %437 = vmatmul.mubr.bf16.vlgmr.msra.gmra.mrb[0].mxu1 %v226_v12  ;;  %4286 = vmatmul.mubr.bf16.vlgmr.msra.gmra.mrb[4].mxu0 %v226_v12 }
 0x280   :  { %v438_v23 = vpop.f32.mrb[0].mxu1  ;;  %v481_v24 = vpop.f32.mrb[4].mxu0 }
 0x281   :  { %v5222_v26 = vadd.f32 %v438_v23, %v264_v21  ;;  %v440_v27 = vpop.f32.mrb[1].mxu1  ;;  %v4287_v28 = vpop.f32.mrb[5].mxu0  ;;  %v482_v31 = vadd.f32 %v481_v24, %v272_v22 }
 0x282   :  { %v442_v29 = vpop.f32.mrb[2].mxu1  ;;  %v484_v30 = vpop.f32.mrb[6].mxu0  ;;  %v441_v35 = vadd.f32 %v440_v27, %v268_v25 }
 0x283   :  { %v485_v32 = vadd.f32 %v484_v30, %v272_v22  ;;  %v444_v33 = vpop.f32.mrb[3].mxu1  ;;  %v4288_v34 = vpop.f32.mrb[7].mxu0  ;;  %4293 = vmatprep.mubr.msk.f32.mxu1 %vm488_vm1, %v5222_v26  ;;  %v5240_v43 = vadd.f32 %v442_v29, %v264_v21 }
 0x284   :  { %v445_v36 = vadd.f32 %v444_v33, %v268_v25 }
 0x285   :  { %v4487_v38 = vpack.c.bf16 %v485_v32, %v482_v31  ;;  %v5232_v39 = vpack.i.bf16 %v485_v32, %v482_v31 }
 0x286   :  { %v4481_v40 = vpack.c.bf16 %v445_v36, %v441_v35  ;;  %v5234_v41 = vpack.i.bf16 %v445_v36, %v441_v35 }
 0x288   :  { %4483 = vmatprep.subr.msk.bf16.mxu1 %vm5228_vm2, %v4481_v40 }
 0x289   :  { %4486 = vmatpush3.bf16.xpose.msk.msra.mxu1 %vm5228_vm2, %v4481_v40 }
 0x28a   :  { %4488 = vmatprep.subr.bf16.mxu1 %v4487_v38 }
 0x290   :  { %4294 = vmatmul.mubr.msk.f32.vlgmr.msra.gmra.mrb[4].mxu1 %vm488_vm1, %v5240_v43 }
 0x291   :  { %4490 = vmatpush3.bf16.msra.mxu1 %v4487_v38 }
 0x363   :  { %v4295_v44 = vpop.f32.mrb[4].mxu1 }
 0x364   :  { %v577_v46 = vmul.f32 0.17677669, %v4295_v44  ;;  %v567_v47 = vpop.f32.mrb[5].mxu1 }
 0x365   :  { %v576_v49 = vmul.f32 0.17677669, %v567_v47 }
 0x366   :  { %v579_v50 = vadd.f32 %v577_v46, %v5247_v45 }
 0x367   :  { %v578_v51 = vadd.f32 %v576_v49, %v5252_v48 }
 0x368   :  { %v584_v52 = vsel %vm580_vm3, %v579_v50, -inf }
 0x369   :  { %585 = vmax.xlane.f32.xlu1 %v584_v52  ;;  %v581_v53 = vsel %vm580_vm3, %v578_v51, -inf }
 0x36a   :  { %582 = vmax.xlane.f32.xlu0 %v581_v53 }
 0x3f6   :  { %v586_v54 = vpop.xlane.xlu1 %585 }
 0x3f7   :  { %v588_v55 = vsub.f32 %v579_v50, %v586_v54  ;;  %v583_v56 = vpop.xlane.xlu0 %582 }
 0x3f8   :  { %v587_v57 = vsub.f32 %v578_v51, %v583_v56 }
 0x3f9   :  { %v591_v58 = vmul.f32 1.442695, %v588_v55 }
 0x3fa   :  { %v589_v59 = vmul.f32 1.442695, %v587_v57 }
 0x3fb   :  { %4841 = vpow2.f32 %v591_v58 }
 0x3fc   :  { %4843 = vpow2.f32 %v589_v59 }
 0x405   :  { %v4842_v60 = vpop.eup %4841 }
 0x406   :  { %v4844_v61 = vpop.eup %4843  ;;  %v596_v62 = vsel %vm580_vm3, %v4842_v60, 0.0 }
 0x407   :  { %597 = vadd.xlane.f32.xlu1 %v596_v62  ;;  %v593_v63 = vsel %vm580_vm3, %v4844_v61, 0.0 }
 0x408   :  { %594 = vadd.xlane.f32.xlu0 %v593_v63 }
 0x418   :  { %684 = vrot.lane.b32.xlu1 %v5222_v26, %s4942_s27 }
 0x41c   :  { %686 = vrot.lane.b32.xlu1 %v5240_v43, %s4942_s27 }
 0x41e   :  { %4572 = vrot.lane.b32.xlu0 %v5234_v41, %s4942_s27 }
 0x494   :  { %v598_v1 = vpop.xlane.xlu1 %597 }
 0x495   :  { %4845 = vrcp.f32 %v598_v1  ;;  %v595_v2 = vpop.xlane.xlu0 %594 }
 0x496   :  { %4847 = vrcp.f32 %v595_v2 }
 0x498   :  { %v685_v11 = vpop.permute.xlu1 %684 }
 0x499   :  { %v4573_v3 = vpop.permute.xlu0 %4572 }
 0x49a   :  { %v4575_v4 = vunpack.i.h.bf16 %v4573_v3  ;;  %v4574_v5 = vunpack.i.l.bf16 %v4573_v3 }
 0x49c   :  { %v4491_v6 = vpack.c.bf16 %v4575_v4, %v4574_v5  ;;  %v687_v12 = vpop.permute.xlu1 %686 }
 0x49e   :  { %4493 = vmatprep.subr.msk.bf16.mxu1 %vm5228_vm2, %v4491_v6 }
 0x49f   :  { %v4846_v7 = vpop.eup %4845 }
 0x4a0   :  { %v4848_v8 = vpop.eup %4847  ;;  %v5270_v10 = vmul.f32 %v4846_v7, %v4842_v60 }
 0x4a1   :  { %v5268_v9 = vmul.f32 %v4848_v8, %v4844_v61 }
 0x4a3   :  { %4300 = vmatprep.mubr.msk.f32.mxu1 %vm580_vm3, %v5268_v9 }
 0x4a4   :  { %4301 = vmatmul.mubr.msk.f32.vlgmr.msra.gmra.mrb[6].mxu1 %vm580_vm3, %v5270_v10 }
 0x4a5   :  { %4496 = vmatpush3.bf16.xpose.msk.msra.mxu1 %vm5228_vm2, %v4491_v6  ;;  %4307 = vmatprep.mubr.msk.f32.mxu1 %vm488_vm1, %v685_v11 }
 0x4ac   :  { %4308 = vmatmul.mubr.msk.f32.vlgmr.msra.gmra.mrb[8].mxu1 %vm488_vm1, %v687_v12 }
 0x577   :  { %v5280_v13 = vpop.f32.mrb[6].mxu1 }
 0x578   :  { %v5282_v17 = vpop.f32.mrb[7].mxu1 }
 0x57f   :  { %v4309_v21 = vpop.f32.mrb[8].mxu1 }
 0x580   :  { %v776_v22 = vmul.f32 0.17677669, %v4309_v21  ;;  %v766_v23 = vpop.f32.mrb[9].mxu1 }
 0x581   :  { %v775_v24 = vmul.f32 0.17677669, %v766_v23 }
 0x582   :  { %v778_v25 = vadd.f32 %v776_v22, %v5247_v45 }
 0x583   :  { %v777_v27 = vadd.f32 %v775_v24, %v5252_v48 }
 0x584   :  { %v782_v28 = vsel %vm580_vm3, %v778_v25, -inf }
 0x585   :  { %783 = vmax.xlane.f32.xlu0 %v782_v28  ;;  %v779_v29 = vsel %vm580_vm3, %v777_v27, -inf }
 0x586   :  { %780 = vmax.xlane.f32.xlu1 %v779_v29 }
 0x597   :  { %4577 = vrot.lane.b32.xlu1 %v5232_v39, %s4942_s27 }
 0x59b   :  { %4587 = vrot.lane.b32.xlu1 %v5234_v41, %s6073_s6 }
 0x59f   :  { %890 = vrot.lane.b32.xlu1 %v5222_v26, %s4944_s28 }
 0x5a3   :  { %892 = vrot.lane.b32.xlu1 %v5240_v43, %s4944_s28 }
 0x5a7   :  { %1096 = vrot.lane.b32.xlu1 %v5240_v43, %s6073_s6 }
 0x612   :  { %v784_v30 = vpop.xlane.xlu0 %783 }
 0x613   :  { %v786_v31 = vsub.f32 %v778_v25, %v784_v30  ;;  %v781_v32 = vpop.xlane.xlu1 %780 }
 0x614   :  { %v785_v33 = vsub.f32 %v777_v27, %v781_v32 }
 0x615   :  { %v789_v34 = vmul.f32 1.442695, %v786_v31 }
 0x616   :  { %v787_v35 = vmul.f32 1.442695, %v785_v33 }
 0x617   :  { %4849 = vpow2.f32 %v789_v34  ;;  %v4578_v36 = vpop.permute.xlu1 %4577 }
 0x618   :  { %v4580_v38 = vunpack.i.h.bf16 %v4578_v36  ;;  %v4579_v40 = vunpack.i.l.bf16 %v4578_v36  ;;  %4851 = vpow2.f32 %v787_v35 }
 0x61a   :  { %v4497_v44 = vpack.c.bf16 %v4580_v38, %v4579_v40 }
 0x61b   :  { %v4588_v46 = vpop.permute.xlu1 %4587 }
 0x61c   :  { %v4590_v47 = vunpack.i.h.bf16 %v4588_v46  ;;  %v4589_v49 = vunpack.i.l.bf16 %v4588_v46  ;;  %4498 = vmatprep.subr.bf16.mxu1 %v4497_v44 }
 0x61d   :  { %4500 = vmatpush3.bf16.msra.mxu1 %v4497_v44 }
 0x61e   :  { %v4511_v50 = vpack.c.bf16 %v4590_v47, %v4589_v49 }
 0x61f   :  { %v891_v55 = vpop.permute.xlu1 %890 }
 0x620   :  { %4513 = vmatprep.subr.msk.bf16.mxu0 %vm5228_vm2, %v4511_v50 }
 0x621   :  { %v4850_v43 = vpop.eup %4849  ;;  %4516 = vmatpush3.bf16.xpose.msk.msra.mxu0 %vm5228_vm2, %v4511_v50 }
 0x622   :  { %v794_v51 = vsel %vm580_vm3, %v4850_v43, 0.0  ;;  %4345 = vmatprep.subr.bf16.mxu0 %v4939_v0  ;;  %v4852_v52 = vpop.eup %4851 }
 0x623   :  { %795 = vadd.xlane.f32.xlu0 %v794_v51  ;;  %v791_v53 = vsel %vm580_vm3, %v4852_v52, 0.0  ;;  %v893_v57 = vpop.permute.xlu1 %892 }
 0x627   :  { %792 = vadd.xlane.f32.xlu0 %v791_v53  ;;  %v1097_v63 = vpop.permute.xlu1 %1096 }
 0x63d   :  { %4582 = vrot.lane.b32.xlu0 %v5234_v41, %s4944_s28 }
 0x641   :  { %1094 = vrot.lane.b32.xlu0 %v5222_v26, %s6073_s6 }
 0x6b0   :  { %v796_v54 = vpop.xlane.xlu0 %795 }
 0x6b1   :  { %4853 = vrcp.f32 %v796_v54 }
 0x6b4   :  { %v793_v56 = vpop.xlane.xlu0 %792 }
 0x6b5   :  { %4855 = vrcp.f32 %v793_v56 }
 0x6b8   :  { %v4583_v58 = vpop.permute.xlu0 %4582 }
 0x6b9   :  { %v4585_v59 = vunpack.i.h.bf16 %v4583_v58  ;;  %v4584_v60 = vunpack.i.l.bf16 %v4583_v58 }
 0x6bb   :  { %v4501_v61 = vpack.c.bf16 %v4585_v59, %v4584_v60  ;;  %v4854_v41 = vpop.eup %4853 }
 0x6bc   :  { %v1095_v62 = vpop.permute.xlu0 %1094  ;;  %v5317_v2 = vmul.f32 %v4854_v41, %v4850_v43 }
 0x6bd   :  { %4503 = vmatprep.subr.msk.bf16.mxu1 %vm5228_vm2, %v4501_v61  ;;  %4335 = vmatprep.mubr.msk.f32.mxu0 %vm488_vm1, %v1095_v62 }
 0x6be   :  { %4336 = vmatmul.mubr.msk.f32.vlgmr.msra.gmra.mrb[8].mxu0 %vm488_vm1, %v1097_v63 }
 0x6bf   :  { %v4856_v26 = vpop.eup %4855  ;;  %4361 = vmatprep.mubr.msk.bf16.mxu0 %vm4940_vm0, %v4939_v0 }
 0x6c0   :  { %v5315_v1 = vmul.f32 %v4856_v26, %v4852_v52 }
 0x6c2   :  { %4314 = vmatprep.mubr.msk.f32.mxu1 %vm580_vm3, %v5315_v1 }
 0x6c3   :  { %4315 = vmatmul.mubr.msk.f32.vlgmr.msra.gmra.mrb[10].mxu1 %vm580_vm3, %v5317_v2 }
 0x6c4   :  { %4506 = vmatpush3.bf16.xpose.msk.msra.mxu1 %vm5228_vm2, %v4501_v61  ;;  %4321 = vmatprep.mubr.msk.f32.mxu1 %vm488_vm1, %v891_v55 }
 0x6cb   :  { %4322 = vmatmul.mubr.msk.f32.vlgmr.msra.gmra.mrb[12].mxu1 %vm488_vm1, %v893_v57 }
 0x791   :  { %v4337_v3 = vpop.f32.mrb[8].mxu0 }
 0x792   :  { %v1176_v4 = vpop.f32.mrb[9].mxu0  ;;  %v1186_v27 = vmul.f32 0.17677669, %v4337_v3 }
 0x793   :  { %v1185_v21 = vmul.f32 0.17677669, %v1176_v4 }
 0x794   :  { %v1188_v31 = vadd.f32 %v1186_v27, %v5247_v45  ;;  %v4704_v27 = vld [vmem:[%s6053_s8 + $0x18] sm:$0xff]  }
 0x795   :  { %v1187_v29 = vadd.f32 %v1185_v21, %v5252_v48 }
 0x796   :  { %v4316_v5 = vpop.f32.mrb[10].mxu1  ;;  %v1192_v32 = vsel %vm580_vm3, %v1188_v31, -inf }
 0x797   :  { %v881_v6 = vpop.f32.mrb[11].mxu1  ;;  %v1189_v30 = vsel %vm580_vm3, %v1187_v29, -inf }
 0x798   :  { %v4601_v7 = vpack.i.bf16 %v4316_v5, %v881_v6 }
 0x79e   :  { %v4323_v8 = vpop.f32.mrb[12].mxu1 }
 0x79f   :  { %v982_v11 = vmul.f32 0.17677669, %v4323_v8  ;;  %v972_v12 = vpop.f32.mrb[13].mxu1 }
 0x7a0   :  { %v981_v22 = vmul.f32 0.17677669, %v972_v12 }
 0x7a1   :  { %v984_v23 = vadd.f32 %v982_v11, %v5247_v45 }
 0x7a2   :  { %v983_v24 = vadd.f32 %v981_v22, %v5252_v48 }
 0x7a3   :  { %v988_v25 = vsel %vm580_vm3, %v984_v23, -inf }
 0x7a4   :  { %989 = vmax.xlane.f32.xlu1 %v988_v25  ;;  %v985_v28 = vsel %vm580_vm3, %v983_v24, -inf  ;;  %v4703_v25 = vld [vmem:[%s6053_s8 + $0x10] sm:$0xff]  }
 0x7a5   :  { %986 = vmax.xlane.f32.xlu0 %v985_v28  ;;  %v4705_v28 = vld [vmem:[%s6053_s8 + $0x20] sm:$0xff]  }
 0x7a9   :  { %1190 = vmax.xlane.f32.xlu0 %v1189_v30  ;;  %v4707_v30 = vld [vmem:[%s6053_s8 + $0x30] sm:$0xff]  }
 0x7ad   :  { %1193 = vmax.xlane.f32.xlu0 %v1192_v32 }
 0x831   :  { %v990_v35 = vpop.xlane.xlu1 %989 }
 0x832   :  { %v987_v33 = vpop.xlane.xlu0 %986  ;;  %v992_v40 = vsub.f32 %v984_v23, %v990_v35  ;;  %v4701_v23 = vld [vmem:[%s6053_s8] sm:$0xff]  }
 0x833   :  { %v991_v34 = vsub.f32 %v983_v24, %v987_v33  ;;  %4346 = vmatpush3.bf16.msra.mxu0 %v4701_v23  ;;  %v4702_v24 = vld [vmem:[%s6053_s8 + $0x8] sm:$0xff]  }
 0x834   :  { %v995_v49 = vmul.f32 1.442695, %v992_v40  ;;  %4347 = vmatprep.subr.bf16.mxu0 %v4939_v0  ;;  %v4723_v23 = vld [vmem:[%s6055_s12 + $0x44] ss:$8 sps:$4 sm:$0xff]  }
 0x835   :  { %v993_v44 = vmul.f32 1.442695, %v991_v34 }
 0x836   :  { %v1191_v36 = vpop.xlane.xlu0 %1190 }
 0x837   :  { %v1195_v38 = vsub.f32 %v1187_v29, %v1191_v36  ;;  %4348 = vmatpush3.bf16.msra.mxu0 %v4702_v24  ;;  %v4706_v29 = vld [vmem:[%s6053_s8 + $0x28] sm:$0xff]  }
 0x838   :  { %4349 = vmatprep.subr.bf16.mxu0 %v4939_v0  ;;  %v4721_v24 = vld [vmem:[%s6055_s12 + $0x40] ss:$8 sps:$4 sm:$0xff]  }
 0x839   :  { %v1197_v46 = vmul.f32 1.442695, %v1195_v38 }
 0x83a   :  { %v1194_v47 = vpop.xlane.xlu0 %1193 }
 0x83b   :  { %4857 = vpow2.f32 %v1197_v46  ;;  %v1196_v48 = vsub.f32 %v1188_v31, %v1194_v47  ;;  %4350 = vmatpush3.bf16.msra.mxu0 %v4703_v25  ;;  %v4708_v31 = vld [vmem:[%s6053_s8 + $0x38] sm:$0xff]  }
 0x83c   :  { %4859 = vpow2.f32 %v993_v44  ;;  %4351 = vmatprep.subr.bf16.mxu0 %v4939_v0  ;;  %v4726_v25 = vld [vmem:[%s6055_s12 + $0x54] ss:$8 sps:$4 sm:$0xff]  }
 0x83d   :  { %v1199_v50 = vmul.f32 1.442695, %v1196_v48 }
 0x83f   :  { %4861 = vpow2.f32 %v1199_v50  ;;  %4352 = vmatpush3.bf16.msra.mxu0 %v4704_v27  ;;  %v4724_v27 = vld [vmem:[%s6055_s12 + $0x50] ss:$8 sps:$4 sm:$0xff]  }
 0x840   :  { %4863 = vpow2.f32 %v995_v49  ;;  %4353 = vmatprep.subr.bf16.mxu0 %v4939_v0 }
 0x843   :  { %4354 = vmatpush3.bf16.msra.mxu0 %v4705_v28  ;;  %v4729_v28 = vld [vmem:[%s6055_s12 + $0x64] ss:$8 sps:$4 sm:$0xff]  }
 0x844   :  { %4355 = vmatprep.subr.bf16.mxu0 %v4939_v0 }
 0x845   :  { %v4858_v45 = vpop.eup %4857 }
 0x846   :  { %v1201_v43 = vsel %vm580_vm3, %v4858_v45, 0.0  ;;  %v4860_v51 = vpop.eup %4859 }
 0x847   :  { %1202 = vadd.xlane.f32.xlu0 %v1201_v43  ;;  %v997_v53 = vsel %vm580_vm3, %v4860_v51, 0.0  ;;  %4356 = vmatpush3.bf16.msra.mxu0 %v4706_v29  ;;  %v4727_v29 = vld [vmem:[%s6055_s12 + $0x60] ss:$8 sps:$4 sm:$0xff]  }
 0x848   :  { %4357 = vmatprep.subr.bf16.mxu0 %v4939_v0 }
 0x849   :  { %v4862_v52 = vpop.eup %4861 }
 0x84a   :  { %v1204_v54 = vsel %vm580_vm3, %v4862_v52, 0.0  ;;  %v4864_v55 = vpop.eup %4863 }
 0x84b   :  { %998 = vadd.xlane.f32.xlu0 %v997_v53  ;;  %1205 = vadd.xlane.f32.xlu1 %v1204_v54  ;;  %v1000_v56 = vsel %vm580_vm3, %v4864_v55, 0.0 }
 0x84c   :  { %4358 = vmatpush3.bf16.msra.mxu0 %v4707_v30  ;;  %v4732_v30 = vld [vmem:[%s6055_s12 + $0x74] ss:$8 sps:$4 sm:$0xff]  }
 0x84d   :  { %4359 = vmatprep.subr.bf16.mxu0 %v4939_v0 }
 0x84f   :  { %1001 = vadd.xlane.f32.xlu1 %v1000_v56 }
 0x850   :  { %4360 = vmatpush3.bf16.msra.mxu0 %v4708_v31  ;;  %v4730_v31 = vld [vmem:[%s6055_s12 + $0x70] ss:$8 sps:$4 sm:$0xff]  }
 0x860   :  { %4597 = vrot.lane.b32.xlu1 %v5232_v39, %s6073_s6 }
 0x861   :  { %4592 = vrot.lane.b32.xlu0 %v5232_v39, %s4944_s28 }
 0x864   :  { %4602 = vrot.lane.b32.xlu1 %v4601_v7, %s6073_s6 }
 0x8d4   :  { %v1203_v57 = vpop.xlane.xlu0 %1202 }
 0x8d8   :  { %v1206_v58 = vpop.xlane.xlu1 %1205  ;;  %v999_v59 = vpop.xlane.xlu0 %998 }
 0x8d9   :  { %4865 = vrcp.f32 %v999_v59 }
 0x8da   :  { %4867 = vrcp.f32 %v1203_v57 }
 0x8dc   :  { %v1002_v60 = vpop.xlane.xlu1 %1001  ;;  %v4593_v61 = vpop.permute.xlu0 %4592 }
 0x8dd   :  { %4869 = vrcp.f32 %v1002_v60  ;;  %v4595_v62 = vunpack.i.h.bf16 %v4593_v61  ;;  %v4594_v63 = vunpack.i.l.bf16 %v4593_v61 }
 0x8de   :  { %4871 = vrcp.f32 %v1206_v58  ;;  %v3834_v58 = vld [vmem:[%s6054_s9] ss:$0 sm:$0xff] }
 0x8df   :  { %v4507_v41 = vpack.c.bf16 %v4595_v62, %v4594_v63 }
 0x8e0   :  { %v4598_v26 = vpop.permute.xlu1 %4597 }
 0x8e1   :  { %v4600_v3 = vunpack.i.h.bf16 %v4598_v26  ;;  %v4599_v4 = vunpack.i.l.bf16 %v4598_v26  ;;  %4508 = vmatprep.subr.bf16.mxu1 %v4507_v41 }
 0x8e2   :  { %4510 = vmatpush3.bf16.msra.mxu1 %v4507_v41 }
 0x8e3   :  { %v4517_v39 = vpack.c.bf16 %v4600_v3, %v4599_v4  ;;  %v4866_v5 = vpop.eup %4865  ;;  %v4714_v4 = vld [vmem:[%s6055_s12 + $0x14] ss:$8 sps:$4 sm:$0xff]  }
 0x8e4   :  { %v5344_v6 = vmul.f32 %v4866_v5, %v4860_v51  ;;  %v4868_v7 = vpop.eup %4867  ;;  %v4603_v40 = vpop.permute.xlu1 %4602  ;;  %v4717_v5 = vld [vmem:[%s6055_s12 + $0x24] ss:$8 sps:$4 sm:$0xff]  }
 0x8e5   :  { %4518 = vmatprep.subr.bf16.mxu1 %v4517_v39  ;;  %v5350_v21 = vmul.f32 %v4868_v7, %v4858_v45  ;;  %v4605_v46 = vunpack.i.h.bf16 %v4603_v40  ;;  %v4604_v47 = vunpack.i.l.bf16 %v4603_v40  ;;  %v4715_v7 = vld [vmem:[%s6055_s12 + $0x20] ss:$8 sps:$4 sm:$0xff]  }
 0x8e6   :  { %4328 = vmatprep.mubr.msk.f32.mxu1 %vm580_vm3, %v5344_v6 }
 0x8e7   :  { %v4870_v8 = vpop.eup %4869  ;;  %v1323_v45 = vsel %vm488_vm1, %v5280_v13, %v4605_v46  ;;  %v1322_v43 = vsel %vm488_vm1, %v5282_v17, %v4604_v47 }
 0x8e8   :  { %v5348_v11 = vmul.f32 %v4870_v8, %v4864_v55  ;;  %v4872_v12 = vpop.eup %4871  ;;  %v4720_v8 = vld [vmem:[%s6055_s12 + $0x34] ss:$8 sps:$4 sm:$0xff]  }
 0x8e9   :  { %v5356_v22 = vmul.f32 %v4872_v12, %v4862_v52  ;;  %v4718_v12 = vld [vmem:[%s6055_s12 + $0x30] ss:$8 sps:$4 sm:$0xff]  }
 0x8ea   :  { %4329 = vmatmul.mubr.msk.f32.vlgmr.msra.gmra.mrb[14].mxu1 %vm580_vm3, %v5348_v11 }
 0x8eb   :  { %4520 = vmatpush3.bf16.msra.mxu1 %v4517_v39  ;;  %4342 = vmatprep.mubr.msk.f32.mxu1 %vm580_vm3, %v5350_v21  ;;  %v4712_v39 = vld [vmem:[%s6055_s12 + $0x10] ss:$8 sps:$4 sm:$0xff]  }
 0x8ee   :  { %4343 = vmatmul.mubr.msk.f32.vlgmr.msra.gmra.mrb[16].mxu1 %vm580_vm3, %v5356_v22 }
 0x8ef   :  { %1632 = vmatprep.mubr.bf16.mxu1 %v4941_v42 }
 0x9bd   :  { %v4330_v32 = vpop.f32.mrb[14].mxu1 }
 0x9be   :  { %v1085_v33 = vpop.f32.mrb[15].mxu1 }
 0x9bf   :  { %v4606_v34 = vpack.i.bf16 %v4330_v32, %v1085_v33 }
 0x9c1   :  { %4607 = vrot.lane.b32.xlu1 %v4606_v34, %s4944_s28  ;;  %v4344_v35 = vpop.f32.mrb[16].mxu1 }
 0x9c2   :  { %v1289_v36 = vpop.f32.mrb[17].mxu1 }
 0x9c3   :  { %v4611_v38 = vpack.i.bf16 %v4344_v35, %v1289_v36 }
 0x9c5   :  { %4612 = vrot.lane.b32.xlu0 %v4611_v38, %s4942_s27 }
 0xa33   :  { %v4608_v44 = vpop.permute.xlu1 %4607 }
 0xa34   :  { %v4610_v48 = vunpack.i.h.bf16 %v4608_v44  ;;  %v4609_v49 = vunpack.i.l.bf16 %v4608_v44 }
 0xa36   :  { %v1326_v53 = vsel %vm1324_vm4, %v1323_v45, %v4610_v48  ;;  %v1325_v54 = vsel %vm1324_vm4, %v1322_v43, %v4609_v49 }
 0xa37   :  { %v4613_v50 = vpop.permute.xlu0 %4612 }
 0xa38   :  { %v4615_v51 = vunpack.i.h.bf16 %v4613_v50  ;;  %v4614_v52 = vunpack.i.l.bf16 %v4613_v50 }
 0xa3a   :  { %v1329_v55 = vsel %vm1327_vm5, %v1326_v53, %v4615_v51  ;;  %v1328_v56 = vsel %vm1327_vm5, %v1325_v54, %v4614_v52 }
 0xa3b   :  { %v1330_v57 = vpack.c.bf16 %v1329_v55, %v1328_v56  ;;  %v3843_v55 = vld [vmem:[%s6056_s10] ss:$0 sm:$0xff] }
 0xa3d   :  { %4362 = vmatmul.mubr.bf16.vlgmr.msra.gmra.mrb[12].mxu0 %v1330_v57 }
 0xb10   :  { %v1436_v13 = vpop.f32.mrb[12].mxu0 }
 0xb11   :  { %v1437_v59 = vadd.f32 %v3834_v58, %v1436_v13  ;;  %v4363_v60 = vpop.f32.mrb[13].mxu0 }
 0xb12   :  { %v1439_v17 = vpop.f32.mrb[14].mxu0 }
 0xb13   :  { %v5406_v61 = vadd.f32 %v1437_v59, %v5108_v15  ;;  %v1440_v62 = vadd.f32 %v3834_v58, %v1439_v17  ;;  %v4364_v63 = vpop.f32.mrb[15].mxu0  ;;  %v4709_v15 = vld [vmem:[%s6055_s12] ss:$8 sps:$4 sm:$0xff]  }
 0xb14   :  { %v3844_v59 = vld [vmem:[%s6057_s11] ss:$0 sm:$0xff] }
 0xb15   :  { %v5409_v41 = vadd.f32 %v1440_v62, %v5110_v18  ;;  %1447 = vadd.xlane.f32.xlu1 %v5406_v61  ;;  %v1451_v26 = vmul.f32 %v5406_v61, %v5406_v61  ;;  %v4711_v18 = vld [vmem:[%s6055_s12 + $0x4] ss:$8 sps:$4 sm:$0xff]  }
 0xb16   :  { %1600 = vmatprep.subr.bf16.mxu1 %v4711_v18  ;;  %v4736_v18 = vld [vmem:[%s6058_s14 + $0x8] sm:$0xff]  }
 0xb17   :  { %1449 = vadd.xlane.f32.xlu0 %v5409_v41  ;;  %v1452_v3 = vmul.f32 %v5409_v41, %v5409_v41  ;;  %1601 = vmatpush1.bf16.msra.mxu1 %v4709_v15  ;;  %v4735_v15 = vld [vmem:[%s6058_s14 + $0x48] sm:$0xff]  }
 0xb18   :  { %1602 = vmatprep.subr.bf16.mxu1 %v4714_v4  ;;  %v4737_v4 = vld [vmem:[%s6058_s14 + $0x50] sm:$0xff]  }
 0xb1b   :  { %1453 = vadd.xlane.f32.xlu0 %v1451_v26  ;;  %1603 = vmatpush1.bf16.msra.mxu1 %v4712_v39  ;;  %v4733_v26 = vld [vmem:[%s6058_s14 + $0x40] sm:$0xff]   ;;  %v4738_v39 = vld [vmem:[%s6058_s14 + $0x10] sm:$0xff]  }
 0xb1c   :  { %1604 = vmatprep.subr.bf16.mxu1 %v4717_v5  ;;  %4146 = vmatprep.subr.bf16.mxu0 %v4733_v26  ;;  %v4739_v5 = vld [vmem:[%s6058_s14 + $0x58] sm:$0xff]  }
 0xb1f   :  { %1455 = vadd.xlane.f32.xlu0 %v1452_v3  ;;  %1605 = vmatpush1.bf16.msra.mxu1 %v4715_v7  ;;  %v4734_v3 = vld [vmem:[%s6058_s14] sm:$0xff]   ;;  %v4740_v7 = vld [vmem:[%s6058_s14 + $0x18] sm:$0xff]  }
 0xb20   :  { %1606 = vmatprep.subr.bf16.mxu1 %v4720_v8  ;;  %4147 = vmatpush3.bf16.msra.mxu0 %v4734_v3  ;;  %v4741_v8 = vld [vmem:[%s6058_s14 + $0x60] sm:$0xff]  }
 0xb21   :  { %4148 = vmatprep.subr.bf16.mxu0 %v4735_v15 }
 0xb23   :  { %1607 = vmatpush1.bf16.msra.mxu1 %v4718_v12  ;;  %v4742_v12 = vld [vmem:[%s6058_s14 + $0x20] sm:$0xff]  }
 0xb24   :  { %1608 = vmatprep.subr.bf16.mxu1 %v4723_v23  ;;  %4149 = vmatpush3.bf16.msra.mxu0 %v4736_v18  ;;  %v4743_v23 = vld [vmem:[%s6058_s14 + $0x68] sm:$0xff]  }
 0xb25   :  { %4150 = vmatprep.subr.bf16.mxu0 %v4737_v4 }
 0xb27   :  { %1609 = vmatpush1.bf16.msra.mxu1 %v4721_v24  ;;  %v4744_v24 = vld [vmem:[%s6058_s14 + $0x28] sm:$0xff]  }
 0xb28   :  { %1610 = vmatprep.subr.bf16.mxu1 %v4726_v25  ;;  %4151 = vmatpush3.bf16.msra.mxu0 %v4738_v39  ;;  %v4745_v25 = vld [vmem:[%s6058_s14 + $0x70] sm:$0xff]  }
 0xb29   :  { %4152 = vmatprep.subr.bf16.mxu0 %v4739_v5 }
 0xb2b   :  { %1611 = vmatpush1.bf16.msra.mxu1 %v4724_v27  ;;  %v4746_v27 = vld [vmem:[%s6058_s14 + $0x30] sm:$0xff]  }
 0xb2c   :  { %1612 = vmatprep.subr.bf16.mxu1 %v4729_v28  ;;  %4153 = vmatpush3.bf16.msra.mxu0 %v4740_v7  ;;  %v4747_v28 = vld [vmem:[%s6058_s14 + $0x78] sm:$0xff]  }
 0xb2d   :  { %4154 = vmatprep.subr.bf16.mxu0 %v4741_v8 }
 0xb2f   :  { %1613 = vmatpush1.bf16.msra.mxu1 %v4727_v29  ;;  %v4748_v29 = vld [vmem:[%s6058_s14 + $0x38] sm:$0xff]  }
 0xb30   :  { %1614 = vmatprep.subr.bf16.mxu1 %v4732_v30  ;;  %4155 = vmatpush3.bf16.msra.mxu0 %v4742_v12  ;;  %v1508_v30 = vld [vmem:[%s6059_s13] sm:$0x3] }
 0xb31   :  { %4156 = vmatprep.subr.bf16.mxu0 %v4743_v23 }
 0xb33   :  { %1615 = vmatpush1.bf16.msra.mxu1 %v4730_v31  ;;  %v1513_v31 = vrot.slane %v1508_v30, %v5209_v16 }
 0xb34   :  { %4157 = vmatpush3.bf16.msra.mxu0 %v4744_v24 }
 0xb35   :  { %4158 = vmatprep.subr.bf16.mxu0 %v4745_v25 }
 0xb38   :  { %4159 = vmatpush3.bf16.msra.mxu0 %v4746_v27 }
 0xb39   :  { %4160 = vmatprep.subr.bf16.mxu0 %v4747_v28 }
 0xb3c   :  { %4161 = vmatpush3.bf16.msra.mxu0 %v4748_v29 }
 0xb3d   :  { %4365 = vmatprep.subr.bf16.mxu0 %v4939_v0 }
 0xba2   :  { %v1448_v32 = vpop.xlane.xlu1 %1447 }
 0xba3   :  { %v1457_v34 = vmul.f32 0.0078125, %v1448_v32  ;;  %v1517_v32 = vrot.slane %v1508_v30, %v5216_v20 }
 0xba4   :  { %v1450_v33 = vpop.xlane.xlu0 %1449 }
 0xba5   :  { %v1461_v36 = vmul.f32 %v1457_v34, %v1457_v34  ;;  %v1458_v38 = vmul.f32 0.0078125, %v1450_v33  ;;  %v1467_v52 = vsub.f32 %v5406_v61, %v1457_v34 }
 0xba7   :  { %v1462_v47 = vmul.f32 %v1458_v38, %v1458_v38  ;;  %v1468_v56 = vsub.f32 %v5409_v41, %v1458_v38 }
 0xba8   :  { %v1454_v35 = vpop.xlane.xlu0 %1453 }
 0xba9   :  { %v1459_v40 = vmul.f32 0.0078125, %v1454_v35 }
 0xbab   :  { %v1463_v44 = vsub.f32 %v1459_v40, %v1461_v36 }
 0xbac   :  { %v1456_v46 = vpop.xlane.xlu0 %1455 }
 0xbad   :  { %v1465_v48 = vmax.f32 %v1463_v44, 0.0  ;;  %v1460_v49 = vmul.f32 0.0078125, %v1456_v46 }
 0xbaf   :  { %v1469_v50 = vadd.f32 1e-12, %v1465_v48  ;;  %v1464_v45 = vsub.f32 %v1460_v49, %v1462_v47 }
 0xbb1   :  { %4873 = vrsqrt.f32 %v1469_v50  ;;  %v1466_v43 = vmax.f32 %v1464_v45, 0.0 }
 0xbb3   :  { %v1470_v51 = vadd.f32 1e-12, %v1466_v43 }
 0xbb5   :  { %4875 = vrsqrt.f32 %v1470_v51 }
 0xbbb   :  { %v4874_v53 = vpop.eup %4873 }
 0xbbc   :  { %v1473_v54 = vmul.f32 %v4874_v53, %v1467_v52 }
 0xbbe   :  { %v1481_v13 = vmul.f32 %v3843_v55, %v1473_v54 }
 0xbbf   :  { %v4876_v57 = vpop.eup %4875 }
 0xbc0   :  { %v1474_v58 = vmul.f32 %v4876_v57, %v1468_v56  ;;  %v1489_v17 = vadd.f32 %v3844_v59, %v1481_v13 }
 0xbc2   :  { %v1482_v60 = vmul.f32 %v3843_v55, %v1474_v58 }
 0xbc4   :  { %v1490_v62 = vadd.f32 %v3844_v59, %v1482_v60 }
 0xbc6   :  { %v1491_v63 = vpack.c.bf16 %v1490_v62, %v1489_v17 }
 0xbc8   :  { %1633 = vmatmul.mubr.bf16.vlgmr.msra.gmra.mrb[20].mxu1 %v1491_v63 }
 0xbc9   :  { %2119 = vmatprep.mubr.bf16.mxu1 %v4941_v42 }
 0xc9b   :  { %v1634_v33 = vpop.f32.mrb[20].mxu1 }
 0xc9c   :  { %v1635_v34 = vadd.f32 %v1634_v33, %v1513_v31  ;;  %v1636_v35 = vpop.f32.mrb[21].mxu1  ;;  %v3861_v33 = vld [vmem:[%s6060_s15] ss:$0 sm:$0xff] }
 0xc9d   :  { %v1637_v36 = vadd.f32 %v1636_v35, %v1517_v32  ;;  %v1638_v38 = vpop.f32.mrb[22].mxu1 }
 0xc9e   :  { %v1643_v40 = vmul.f32 %v1635_v34, %v1635_v34  ;;  %v1639_v44 = vadd.f32 %v1638_v38, %v1513_v31  ;;  %v1640_v46 = vpop.f32.mrb[23].mxu1 }
 0xc9f   :  { %v1644_v47 = vmul.f32 %v1637_v36, %v1637_v36  ;;  %v1641_v48 = vadd.f32 %v1640_v46, %v1517_v32 }
 0xca0   :  { %v1647_v49 = vmul.f32 %v1643_v40, %v1635_v34  ;;  %v1645_v50 = vmul.f32 %v1639_v44, %v1639_v44 }
 0xca1   :  { %v1648_v45 = vmul.f32 %v1644_v47, %v1637_v36  ;;  %v1646_v43 = vmul.f32 %v1641_v48, %v1641_v48 }
 0xca2   :  { %v1651_v51 = vmul.f32 0.044715, %v1647_v49  ;;  %v1649_v52 = vmul.f32 %v1645_v50, %v1639_v44 }
 0xca3   :  { %v1652_v53 = vmul.f32 0.044715, %v1648_v45  ;;  %v1650_v54 = vmul.f32 %v1646_v43, %v1641_v48  ;;  %v4752_v45 = vld [vmem:[%s6084_s24 + $0xc8] ss:$12 sps:$4 sm:$0xff]  }
 0xca4   :  { %v1655_v55 = vadd.f32 %v1651_v51, %v1635_v34  ;;  %v1653_v56 = vmul.f32 0.044715, %v1649_v52  ;;  %v4755_v43 = vld [vmem:[%s6084_s24 + $0xdc] ss:$12 sps:$4 sm:$0xff]   ;;  %v4753_v51 = vld [vmem:[%s6084_s24 + $0xd8] ss:$12 sps:$4 sm:$0xff]  }
 0xca5   :  { %v1656_v57 = vadd.f32 %v1652_v53, %v1637_v36  ;;  %v1654_v58 = vmul.f32 0.044715, %v1650_v54  ;;  %v4756_v52 = vld [vmem:[%s6084_s24 + $0xe0] ss:$12 sps:$4 sm:$0xff]   ;;  %v4757_v54 = vld [vmem:[%s6084_s24 + $0xf0] ss:$12 sps:$4 sm:$0xff]  }
 0xca6   :  { %v1659_v13 = vmul.f32 0.7978846, %v1655_v55  ;;  %v1657_v59 = vadd.f32 %v1653_v56, %v1639_v44  ;;  %v4759_v53 = vld [vmem:[%s6084_s24 + $0xf4] ss:$12 sps:$4 sm:$0xff]   ;;  %v4760_v55 = vld [vmem:[%s6084_s24 + $0xf8] ss:$12 sps:$4 sm:$0xff]  }
 0xca7   :  { %v1660_v60 = vmul.f32 0.7978846, %v1656_v57  ;;  %v1658_v17 = vadd.f32 %v1654_v58, %v1641_v48  ;;  %v4763_v56 = vld [vmem:[%s6084_s24 + $0x10c] ss:$12 sps:$4 sm:$0xff]   ;;  %v4761_v57 = vld [vmem:[%s6084_s24 + $0x108] ss:$12 sps:$4 sm:$0xff]  }
 0xca8   :  { %4877 = vtanh.f32 %v1659_v13  ;;  %v1661_v62 = vmul.f32 0.7978846, %v1657_v59  ;;  %v4764_v58 = vld [vmem:[%s6084_s24 + $0x110] ss:$12 sps:$4 sm:$0xff]   ;;  %v4765_v59 = vld [vmem:[%s6084_s24 + $0x120] ss:$12 sps:$4 sm:$0xff]  }
 0xca9   :  { %4879 = vtanh.f32 %v1660_v60  ;;  %v1662_v63 = vmul.f32 0.7978846, %v1658_v17  ;;  %v4767_v13 = vld [vmem:[%s6084_s24 + $0x124] ss:$12 sps:$4 sm:$0xff]   ;;  %v4768_v60 = vld [vmem:[%s6084_s24 + $0x128] ss:$12 sps:$4 sm:$0xff]  }
 0xcaa   :  { %4881 = vtanh.f32 %v1661_v62  ;;  %v4771_v17 = vld [vmem:[%s6084_s24 + $0x13c] ss:$12 sps:$4 sm:$0xff]   ;;  %v4769_v62 = vld [vmem:[%s6084_s24 + $0x138] ss:$12 sps:$4 sm:$0xff]  }
 0xcab   :  { %4883 = vtanh.f32 %v1662_v63  ;;  %v4772_v63 = vld [vmem:[%s6084_s24 + $0x140] ss:$12 sps:$4 sm:$0xff]  }
 0xcb2   :  { %v4878_v26 = vpop.eup %4877 }
 0xcb3   :  { %v4880_v3 = vpop.eup %4879  ;;  %v1667_v15 = vadd.f32 1.0, %v4878_v26  ;;  %v4775_v26 = vld [vmem:[%s6084_s24 + $0x154] ss:$12 sps:$4 sm:$0xff]  }
 0xcb4   :  { %v4882_v18 = vpop.eup %4881  ;;  %v1668_v4 = vadd.f32 1.0, %v4880_v3  ;;  %v4773_v3 = vld [vmem:[%s6084_s24 + $0x150] ss:$12 sps:$4 sm:$0xff]  }
 0xcb5   :  { %v4884_v39 = vpop.eup %4883  ;;  %v1671_v5 = vmul.f32 0.5, %v1667_v15  ;;  %v1669_v7 = vadd.f32 1.0, %v4882_v18  ;;  %v4776_v15 = vld [vmem:[%s6084_s24 + $0x158] ss:$12 sps:$4 sm:$0xff]  }
 0xcb6   :  { %v1670_v8 = vadd.f32 1.0, %v4884_v39  ;;  %v1672_v12 = vmul.f32 0.5, %v1668_v4  ;;  %v4779_v18 = vld [vmem:[%s6084_s24 + $0x16c] ss:$12 sps:$4 sm:$0xff]   ;;  %v4777_v4 = vld [vmem:[%s6084_s24 + $0x168] ss:$12 sps:$4 sm:$0xff]  }
 0xcb7   :  { %v1673_v23 = vmul.f32 0.5, %v1669_v7  ;;  %v1675_v25 = vmul.f32 %v1671_v5, %v1635_v34  ;;  %v4780_v39 = vld [vmem:[%s6084_s24 + $0x170] ss:$12 sps:$4 sm:$0xff]  }
 0xcb8   :  { %v1674_v24 = vmul.f32 0.5, %v1670_v8  ;;  %v1676_v28 = vmul.f32 %v1672_v12, %v1637_v36 }
 0xcb9   :  { %v1677_v27 = vmul.f32 %v1673_v23, %v1639_v44 }
 0xcba   :  { %v1678_v29 = vmul.f32 %v1674_v24, %v1641_v48 }
 0xcbb   :  { %v1679_v30 = vpack.c.bf16 %v1677_v27, %v1675_v25 }
 0xcbc   :  { %v1680_v31 = vpack.c.bf16 %v1678_v29, %v1676_v28 }
 0xcbe   :  { %1848 = vmatprep.mubr.bf16.mxu0 %v1680_v31 }
 0xcbf   :  { %1849 = vmatmul.mubr.bf16.vlgmr.msra.gmra.mrb[16].mxu0 %v1679_v30 }
 0xcc0   :  { %4381 = vmatprep.mubr.msk.bf16.mxu0 %vm4940_vm0, %v4939_v0  ;;  %4366 = vmatpush3.bf16.msra.mxu0 %v4752_v45 }
 0xcc1   :  { %4367 = vmatprep.subr.bf16.mxu0 %v4939_v0 }
 0xcc4   :  { %4368 = vmatpush3.bf16.msra.mxu0 %v4756_v52 }
 0xcc5   :  { %4369 = vmatprep.subr.bf16.mxu0 %v4939_v0 }
 0xcc8   :  { %4370 = vmatpush3.bf16.msra.mxu0 %v4760_v55 }
 0xcc9   :  { %4371 = vmatprep.subr.bf16.mxu0 %v4939_v0 }
 0xccc   :  { %4372 = vmatpush3.bf16.msra.mxu0 %v4764_v58 }
 0xccd   :  { %4373 = vmatprep.subr.bf16.mxu0 %v4939_v0 }
 0xcd0   :  { %4374 = vmatpush3.bf16.msra.mxu0 %v4768_v60 }
 0xcd1   :  { %4375 = vmatprep.subr.bf16.mxu0 %v4939_v0 }
 0xcd4   :  { %4376 = vmatpush3.bf16.msra.mxu0 %v4772_v63 }
 0xcd5   :  { %4377 = vmatprep.subr.bf16.mxu0 %v4939_v0 }
 0xcd8   :  { %4378 = vmatpush3.bf16.msra.mxu0 %v4776_v15 }
 0xcd9   :  { %4379 = vmatprep.subr.bf16.mxu0 %v4939_v0 }
 0xcdc   :  { %4380 = vmatpush3.bf16.msra.mxu0 %v4780_v39 }
 0xd92   :  { %v4162_v32 = vpop.f32.mrb[16].mxu0 }
 0xd93   :  { %v4163_v35 = vpop.f32.mrb[17].mxu0 }
 0xd94   :  { %v4164_v38 = vadd.f32 %v4163_v35, %v4162_v32  ;;  %v4165_v40 = vpop.f32.mrb[18].mxu0 }
 0xd95   :  { %v4166_v46 = vpop.f32.mrb[19].mxu0 }
 0xd96   :  { %v1851_v34 = vadd.f32 %v4164_v38, %v3861_v33  ;;  %v4167_v44 = vadd.f32 %v4166_v46, %v4165_v40 }
 0xd98   :  { %v5534_v36 = vadd.f32 %v1851_v34, %v5406_v61  ;;  %v1854_v47 = vadd.f32 %v4167_v44, %v3861_v33  ;;  %v4751_v61 = vld [vmem:[%s6084_s24 + $0xc4] ss:$12 sps:$4 sm:$0xff]   ;;  %v3880_v34 = vld [vmem:[%s6085_s3 + $0x1] ss:$0 sm:$0xff] }
 0xd99   :  { %2087 = vmatprep.subr.bf16.mxu1 %v4751_v61 }
 0xd9a   :  { %v5537_v48 = vadd.f32 %v1854_v47, %v5409_v41  ;;  %1863 = vadd.xlane.f32.xlu1 %v5534_v36  ;;  %v1867_v49 = vmul.f32 %v5534_v36, %v5534_v36  ;;  %v4749_v41 = vld [vmem:[%s6084_s24 + $0xc0] ss:$12 sps:$4 sm:$0xff]   ;;  %s4945_s24 = smov 16  }
 0xd9b   :  { %2088 = vmatpush1.bf16.msra.mxu1 %v4749_v41 }
 0xd9c   :  { %1865 = vadd.xlane.f32.xlu0 %v5537_v48  ;;  %v1868_v50 = vmul.f32 %v5537_v48, %v5537_v48  ;;  %2089 = vmatprep.subr.bf16.mxu1 %v4755_v43 }
 0xd9e   :  { %1869 = vadd.xlane.f32.xlu1 %v1867_v49 }
 0xd9f   :  { %2090 = vmatpush1.bf16.msra.mxu1 %v4753_v51 }
 0xda0   :  { %1871 = vadd.xlane.f32.xlu0 %v1868_v50  ;;  %2091 = vmatprep.subr.bf16.mxu1 %v4759_v53  ;;  %v3881_v50 = vld [vmem:[%s6086_s30 + $0x1] ss:$0 sm:$0xff]  ;;  %v3914_v53 = vld [vmem:[%s6051_s7 + $0x3] sm:$0x7]  ;;  %s4947_s30 = smov 80  }
 0xda1   :  { %v1955_v55 = vrot.slane %v3914_v53, %v271_v19  ;;  %v1951_v58 = vrot.slane %v3914_v53, %v5216_v20 }
 0xda3   :  { %2092 = vmatpush1.bf16.msra.mxu1 %v4757_v54  ;;  %v1947_v54 = vrot.slane %v3914_v53, %v5209_v16 }
 0xda4   :  { %2093 = vmatprep.subr.bf16.mxu1 %v4763_v56 }
 0xda7   :  { %2094 = vmatpush1.bf16.msra.mxu1 %v4761_v57 }
 0xda8   :  { %2095 = vmatprep.subr.bf16.mxu1 %v4767_v13 }
 0xdab   :  { %2096 = vmatpush1.bf16.msra.mxu1 %v4765_v59 }
 0xdac   :  { %2097 = vmatprep.subr.bf16.mxu1 %v4771_v17 }
 0xdaf   :  { %2098 = vmatpush1.bf16.msra.mxu1 %v4769_v62 }
 0xdb0   :  { %2099 = vmatprep.subr.bf16.mxu1 %v4775_v26 }
 0xdb3   :  { %2100 = vmatpush1.bf16.msra.mxu1 %v4773_v3 }
 0xdb4   :  { %2101 = vmatprep.subr.bf16.mxu1 %v4779_v18 }
 0xdb7   :  { %2102 = vmatpush1.bf16.msra.mxu1 %v4777_v4 }
 0xe27   :  { %v1864_v5 = vpop.xlane.xlu1 %1863 }
 0xe28   :  { %v1873_v7 = vmul.f32 0.0078125, %v1864_v5 }
 0xe29   :  { %v1866_v8 = vpop.xlane.xlu0 %1865 }
 0xe2a   :  { %v1874_v12 = vmul.f32 0.0078125, %v1866_v8  ;;  %v1877_v24 = vmul.f32 %v1873_v7, %v1873_v7  ;;  %v1883_v40 = vsub.f32 %v5534_v36, %v1873_v7 }
 0xe2b   :  { %v1870_v23 = vpop.xlane.xlu1 %1869 }
 0xe2c   :  { %v1875_v25 = vmul.f32 0.0078125, %v1870_v23  ;;  %v1878_v28 = vmul.f32 %v1874_v12, %v1874_v12  ;;  %v1884_v44 = vsub.f32 %v5537_v48, %v1874_v12 }
 0xe2d   :  { %v1872_v27 = vpop.xlane.xlu0 %1871 }
 0xe2e   :  { %v1879_v29 = vsub.f32 %v1875_v25, %v1877_v24  ;;  %v1876_v30 = vmul.f32 0.0078125, %v1872_v27  ;;  %v5658_v25 = vld [vmem:[%s6052_s2 + $0x8] sm:$0xff] }
 0xe30   :  { %v1881_v31 = vmax.f32 %v1879_v29, 0.0  ;;  %v1880_v32 = vsub.f32 %v1876_v30, %v1878_v28  ;;  %v5664_v28 = vld [vmem:[%s6052_s2] sm:$0xff]  ;;  %s6089_s2 = smov 32  }
 0xe32   :  { %v1885_v33 = vadd.f32 1e-12, %v1881_v31  ;;  %v1882_v35 = vmax.f32 %v1880_v32, 0.0 }
 0xe34   :  { %4885 = vrsqrt.f32 %v1885_v33  ;;  %v1886_v38 = vadd.f32 1e-12, %v1882_v35 }
 0xe36   :  { %4887 = vrsqrt.f32 %v1886_v38 }
 0xe3e   :  { %v4886_v46 = vpop.eup %4885 }
 0xe3f   :  { %v1889_v47 = vmul.f32 %v4886_v46, %v1883_v40 }
 0xe40   :  { %v4888_v49 = vpop.eup %4887 }
 0xe41   :  { %v1890_v61 = vmul.f32 %v4888_v49, %v1884_v44  ;;  %v1897_v41 = vmul.f32 %v3880_v34, %v1889_v47 }
 0xe43   :  { %v1898_v45 = vmul.f32 %v3880_v34, %v1890_v61  ;;  %v1905_v43 = vadd.f32 %v3881_v50, %v1897_v41 }
 0xe45   :  { %v1906_v51 = vadd.f32 %v3881_v50, %v1898_v45 }
 0xe47   :  { %v1907_v52 = vpack.c.bf16 %v1906_v51, %v1905_v43 }
 0xe49   :  { %2120 = vmatmul.mubr.bf16.vlgmr.msra.gmra.mrb[24].mxu1 %v1907_v52  ;;  %4382 = vmatmul.mubr.bf16.vlgmr.msra.gmra.mrb[20].mxu0 %v1907_v52 }
 0xf1c   :  { %v2121_v56 = vpop.f32.mrb[24].mxu1  ;;  %v2164_v57 = vpop.f32.mrb[20].mxu0 }
 0xf1d   :  { %v5639_v13 = vadd.f32 %v2121_v56, %v1947_v54  ;;  %v2123_v59 = vpop.f32.mrb[25].mxu1  ;;  %v4383_v60 = vpop.f32.mrb[21].mxu0  ;;  %v2165_v63 = vadd.f32 %v2164_v57, %v1955_v55 }
 0xf1e   :  { %v2125_v17 = vpop.f32.mrb[26].mxu1  ;;  %v2167_v62 = vpop.f32.mrb[22].mxu0  ;;  %v2124_v18 = vadd.f32 %v2123_v59, %v1951_v58 }
 0xf1f   :  { %v2168_v26 = vadd.f32 %v2167_v62, %v1955_v55  ;;  %v2127_v3 = vpop.f32.mrb[27].mxu1  ;;  %v4384_v15 = vpop.f32.mrb[23].mxu0  ;;  %4389 = vmatprep.mubr.msk.f32.mxu1 %vm488_vm1, %v5639_v13  ;;  %v5651_v7 = vadd.f32 %v2125_v17, %v1947_v54 }
 0xf20   :  { %v2128_v14 = vadd.f32 %v2127_v3, %v1951_v58 }
 0xf21   :  { %v4527_v19 = vpack.c.bf16 %v2168_v26, %v2165_v63  ;;  %v5643_v4 = vpack.i.bf16 %v2168_v26, %v2165_v63 }
 0xf22   :  { %v4521_v39 = vpack.c.bf16 %v2128_v14, %v2124_v18  ;;  %v5645_v5 = vpack.i.bf16 %v2128_v14, %v2124_v18 }
 0xf24   :  { %4523 = vmatprep.subr.msk.bf16.mxu1 %vm5228_vm2, %v4521_v39 }
 0xf25   :  { %4526 = vmatpush3.bf16.xpose.msk.msra.mxu1 %vm5228_vm2, %v4521_v39 }
 0xf26   :  { %4528 = vmatprep.subr.bf16.mxu1 %v4527_v19 }
 0xf2c   :  { %4390 = vmatmul.mubr.msk.f32.vlgmr.msra.gmra.mrb[18].mxu1 %vm488_vm1, %v5651_v7 }
 0xf2d   :  { %4530 = vmatpush3.bf16.msra.mxu1 %v4527_v19 }
 0xfff   :  { %v4391_v8 = vpop.f32.mrb[18].mxu1 }
0x1000   :  { %v2259_v12 = vmul.f32 0.17677669, %v4391_v8  ;;  %v2249_v23 = vpop.f32.mrb[19].mxu1 }
0x1001   :  { %v2258_v24 = vmul.f32 0.17677669, %v2249_v23 }
0x1002   :  { %v2261_v27 = vadd.f32 %v5658_v25, %v2259_v12 }
0x1003   :  { %v2260_v29 = vadd.f32 %v5664_v28, %v2258_v24 }
0x1004   :  { %v2265_v30 = vsel %vm580_vm3, %v2261_v27, -inf }
0x1005   :  { %2266 = vmax.xlane.f32.xlu0 %v2265_v30  ;;  %v2262_v31 = vsel %vm580_vm3, %v2260_v29, -inf }
0x1006   :  { %2263 = vmax.xlane.f32.xlu1 %v2262_v31 }
0x1017   :  { %4617 = vrot.lane.b32.xlu1 %v5645_v5, %s4942_s27 }
0x1092   :  { %v2267_v32 = vpop.xlane.xlu0 %2266 }
0x1093   :  { %v2269_v33 = vsub.f32 %v2261_v27, %v2267_v32  ;;  %v2264_v35 = vpop.xlane.xlu1 %2263 }
0x1094   :  { %v2268_v38 = vsub.f32 %v2260_v29, %v2264_v35 }
0x1095   :  { %v2272_v40 = vmul.f32 1.442695, %v2269_v33 }
0x1096   :  { %v2270_v46 = vmul.f32 1.442695, %v2268_v38 }
0x1097   :  { %4889 = vpow2.f32 %v2272_v40  ;;  %v4618_v34 = vpop.permute.xlu1 %4617 }
0x1098   :  { %4891 = vpow2.f32 %v2270_v46  ;;  %v4620_v44 = vunpack.i.h.bf16 %v4618_v34  ;;  %v4619_v47 = vunpack.i.l.bf16 %v4618_v34 }
0x109a   :  { %v4531_v49 = vpack.c.bf16 %v4620_v44, %v4619_v47 }
0x109c   :  { %4533 = vmatprep.subr.msk.bf16.mxu1 %vm5228_vm2, %v4531_v49 }
0x10a1   :  { %v4890_v50 = vpop.eup %4889 }
0x10a2   :  { %v4892_v61 = vpop.eup %4891  ;;  %v2277_v41 = vsel %vm580_vm3, %v4890_v50, 0.0 }
0x10a3   :  { %2278 = vadd.xlane.f32.xlu0 %v2277_v41  ;;  %v2274_v45 = vsel %vm580_vm3, %v4892_v61, 0.0 }
0x10a4   :  { %2275 = vadd.xlane.f32.xlu1 %v2274_v45 }
0x10b5   :  { %2367 = vrot.lane.b32.xlu1 %v5651_v7, %s4942_s27 }
0x10b9   :  { %2365 = vrot.lane.b32.xlu0 %v5639_v13, %s4942_s27 }
0x1130   :  { %v2279_v43 = vpop.xlane.xlu0 %2278 }
0x1131   :  { %4893 = vrcp.f32 %v2279_v43  ;;  %v2276_v51 = vpop.xlane.xlu1 %2275 }
0x1132   :  { %4895 = vrcp.f32 %v2276_v51 }
0x1134   :  { %v2366_v56 = vpop.permute.xlu0 %2365 }
0x1135   :  { %v2368_v57 = vpop.permute.xlu1 %2367 }
0x113b   :  { %v4894_v52 = vpop.eup %4893 }
0x113c   :  { %v4896_v53 = vpop.eup %4895  ;;  %v5681_v55 = vmul.f32 %v4894_v52, %v4890_v50 }
0x113d   :  { %v5679_v54 = vmul.f32 %v4896_v53, %v4892_v61 }
0x113f   :  { %4396 = vmatprep.mubr.msk.f32.mxu1 %vm580_vm3, %v5679_v54 }
0x1140   :  { %4397 = vmatmul.mubr.msk.f32.vlgmr.msra.gmra.mrb[28].mxu1 %vm580_vm3, %v5681_v55 }
0x1141   :  { %4536 = vmatpush3.bf16.xpose.msk.msra.mxu1 %vm5228_vm2, %v4531_v49  ;;  %4403 = vmatprep.mubr.msk.f32.mxu1 %vm488_vm1, %v2366_v56 }
0x1148   :  { %4404 = vmatmul.mubr.msk.f32.vlgmr.msra.gmra.mrb[30].mxu1 %vm488_vm1, %v2368_v57 }
0x1213   :  { %v5691_v58 = vpop.f32.mrb[28].mxu1 }
0x1214   :  { %v5693_v59 = vpop.f32.mrb[29].mxu1 }
0x121b   :  { %v4405_v60 = vpop.f32.mrb[30].mxu1 }
0x121c   :  { %v2457_v17 = vmul.f32 0.17677669, %v4405_v60  ;;  %v2447_v62 = vpop.f32.mrb[31].mxu1 }
0x121d   :  { %v2456_v63 = vmul.f32 0.17677669, %v2447_v62 }
0x121e   :  { %v2459_v26 = vadd.f32 %v5658_v25, %v2457_v17 }
0x121f   :  { %v2458_v3 = vadd.f32 %v5664_v28, %v2456_v63 }
0x1220   :  { %v2463_v15 = vsel %vm580_vm3, %v2459_v26, -inf }
0x1221   :  { %2464 = vmax.xlane.f32.xlu0 %v2463_v15  ;;  %v2460_v18 = vsel %vm580_vm3, %v2458_v3, -inf }
0x1222   :  { %2461 = vmax.xlane.f32.xlu1 %v2460_v18 }
0x12ae   :  { %v2465_v14 = vpop.xlane.xlu0 %2464 }
0x12af   :  { %v2467_v19 = vsub.f32 %v2459_v26, %v2465_v14  ;;  %v2462_v39 = vpop.xlane.xlu1 %2461 }
0x12b0   :  { %v2466_v8 = vsub.f32 %v2458_v3, %v2462_v39 }
0x12b1   :  { %v2470_v12 = vmul.f32 1.442695, %v2467_v19 }
0x12b2   :  { %v2468_v23 = vmul.f32 1.442695, %v2466_v8 }
0x12b3   :  { %4897 = vpow2.f32 %v2470_v12 }
0x12b4   :  { %4899 = vpow2.f32 %v2468_v23 }
0x12bd   :  { %v4898_v24 = vpop.eup %4897 }
0x12be   :  { %v4900_v27 = vpop.eup %4899  ;;  %v2475_v29 = vsel %vm580_vm3, %v4898_v24, 0.0 }
0x12bf   :  { %2476 = vadd.xlane.f32.xlu1 %v2475_v29  ;;  %v2472_v30 = vsel %vm580_vm3, %v4900_v27, 0.0 }
0x12c0   :  { %2473 = vadd.xlane.f32.xlu0 %v2472_v30 }
0x12d0   :  { %4627 = vrot.lane.b32.xlu1 %v5645_v5, %s4944_s28 }
0x12d4   :  { %4632 = vrot.lane.b32.xlu1 %v5645_v5, %s6089_s2 }
0x12d6   :  { %4622 = vrot.lane.b32.xlu0 %v5643_v4, %s4942_s27 }
0x12d8   :  { %2571 = vrot.lane.b32.xlu1 %v5639_v13, %s4944_s28 }
0x12da   :  { %2573 = vrot.lane.b32.xlu0 %v5651_v7, %s4944_s28 }
0x12dc   :  { %2775 = vrot.lane.b32.xlu1 %v5639_v13, %s6089_s2 }
0x12de   :  { %2777 = vrot.lane.b32.xlu0 %v5651_v7, %s6089_s2 }
0x134c   :  { %v2477_v31 = vpop.xlane.xlu1 %2476 }
0x134d   :  { %4901 = vrcp.f32 %v2477_v31  ;;  %v2474_v32 = vpop.xlane.xlu0 %2473 }
0x134e   :  { %4903 = vrcp.f32 %v2474_v32 }
0x1350   :  { %v4628_v5 = vpop.permute.xlu1 %4627 }
0x1351   :  { %v4623_v33 = vpop.permute.xlu0 %4622  ;;  %v4630_v35 = vunpack.i.h.bf16 %v4628_v5  ;;  %v4629_v38 = vunpack.i.l.bf16 %v4628_v5 }
0x1352   :  { %v4625_v40 = vunpack.i.h.bf16 %v4623_v33  ;;  %v4624_v46 = vunpack.i.l.bf16 %v4623_v33 }
0x1353   :  { %v4541_v50 = vpack.c.bf16 %v4630_v35, %v4629_v38 }
0x1354   :  { %v4537_v34 = vpack.c.bf16 %v4625_v40, %v4624_v46  ;;  %v4633_v44 = vpop.permute.xlu1 %4632 }
0x1355   :  { %v4635_v47 = vunpack.i.h.bf16 %v4633_v44  ;;  %v4634_v49 = vunpack.i.l.bf16 %v4633_v44  ;;  %v2574_v51 = vpop.permute.xlu0 %2573 }
0x1356   :  { %4538 = vmatprep.subr.bf16.mxu1 %v4537_v34 }
0x1357   :  { %v4902_v13 = vpop.eup %4901  ;;  %v4551_v61 = vpack.c.bf16 %v4635_v47, %v4634_v49  ;;  %4540 = vmatpush3.bf16.msra.mxu1 %v4537_v34 }
0x1358   :  { %v4904_v7 = vpop.eup %4903  ;;  %v2572_v41 = vpop.permute.xlu1 %2571  ;;  %4543 = vmatprep.subr.msk.bf16.mxu1 %vm5228_vm2, %v4541_v50  ;;  %v5721_v43 = vmul.f32 %v4902_v13, %v4898_v24 }
0x1359   :  { %4553 = vmatprep.subr.msk.bf16.mxu0 %vm5228_vm2, %v4551_v61  ;;  %v5719_v45 = vmul.f32 %v4904_v7, %v4900_v27  ;;  %v2778_v53 = vpop.permute.xlu0 %2777 }
0x135a   :  { %4556 = vmatpush3.bf16.xpose.msk.msra.mxu0 %vm5228_vm2, %v4551_v61 }
0x135b   :  { %4410 = vmatprep.mubr.msk.f32.mxu1 %vm580_vm3, %v5719_v45  ;;  %4441 = vmatprep.subr.bf16.mxu0 %v4939_v0 }
0x135c   :  { %4411 = vmatmul.mubr.msk.f32.vlgmr.msra.gmra.mrb[32].mxu1 %vm580_vm3, %v5721_v43  ;;  %v2776_v52 = vpop.permute.xlu1 %2775 }
0x135d   :  { %4417 = vmatprep.mubr.msk.f32.mxu1 %vm488_vm1, %v2572_v41  ;;  %4431 = vmatprep.mubr.msk.f32.mxu0 %vm488_vm1, %v2776_v52 }
0x1360   :  { %4546 = vmatpush3.bf16.xpose.msk.msra.mxu1 %vm5228_vm2, %v4541_v50 }
0x1361   :  { %4432 = vmatmul.mubr.msk.f32.vlgmr.msra.gmra.mrb[10].mxu0 %vm488_vm1, %v2778_v53 }
0x1362   :  { %4457 = vmatprep.mubr.msk.bf16.mxu0 %vm4940_vm0, %v4939_v0 }
0x1367   :  { %4418 = vmatmul.mubr.msk.f32.vlgmr.msra.gmra.mrb[34].mxu1 %vm488_vm1, %v2574_v51 }
0x142f   :  { %v4412_v56 = vpop.f32.mrb[32].mxu1 }
0x1430   :  { %v2562_v57 = vpop.f32.mrb[33].mxu1 }
0x1431   :  { %v4646_v60 = vpack.i.bf16 %v4412_v56, %v2562_v57 }
0x1434   :  { %v4433_v17 = vpop.f32.mrb[10].mxu0 }
0x1435   :  { %v2857_v62 = vpop.f32.mrb[11].mxu0  ;;  %v2867_v19 = vmul.f32 0.17677669, %v4433_v17 }
0x1436   :  { %v2866_v26 = vmul.f32 0.17677669, %v2857_v62 }
0x1437   :  { %v2869_v24 = vadd.f32 %v5658_v25, %v2867_v19 }
0x1438   :  { %v2868_v8 = vadd.f32 %v5664_v28, %v2866_v26 }
0x1439   :  { %v2873_v27 = vsel %vm580_vm3, %v2869_v24, -inf }
0x143a   :  { %v4419_v63 = vpop.f32.mrb[34].mxu1  ;;  %v2870_v23 = vsel %vm580_vm3, %v2868_v8, -inf }
0x143b   :  { %v2663_v3 = vmul.f32 0.17677669, %v4419_v63  ;;  %v2653_v15 = vpop.f32.mrb[35].mxu1 }
0x143c   :  { %v2662_v18 = vmul.f32 0.17677669, %v2653_v15 }
0x143d   :  { %v2665_v37 = vadd.f32 %v5658_v25, %v2663_v3 }
0x143e   :  { %v2664_v14 = vadd.f32 %v5664_v28, %v2662_v18 }
0x143f   :  { %v2669_v39 = vsel %vm580_vm3, %v2665_v37, -inf }
0x1440   :  { %2670 = vmax.xlane.f32.xlu0 %v2669_v39  ;;  %v2666_v12 = vsel %vm580_vm3, %v2664_v14, -inf }
0x1441   :  { %2667 = vmax.xlane.f32.xlu1 %v2666_v12  ;;  %v4781_v12 = vld [vmem:[%s6053_s8 + $0x40] sm:$0xff]  }
0x1442   :  { %4442 = vmatpush3.bf16.msra.mxu0 %v4781_v12  ;;  %v4797_v12 = vld [vmem:[%s6055_s12 + $0xa4] ss:$8 sps:$4 sm:$0xff]  }
0x1443   :  { %4443 = vmatprep.subr.bf16.mxu0 %v4939_v0 }
0x1444   :  { %2871 = vmax.xlane.f32.xlu0 %v2870_v23  ;;  %v4782_v23 = vld [vmem:[%s6053_s8 + $0x48] sm:$0xff]  }
0x1446   :  { %4444 = vmatpush3.bf16.msra.mxu0 %v4782_v23  ;;  %v4795_v23 = vld [vmem:[%s6055_s12 + $0xa0] ss:$8 sps:$4 sm:$0xff]  }
0x1447   :  { %4445 = vmatprep.subr.bf16.mxu0 %v4939_v0 }
0x1448   :  { %2874 = vmax.xlane.f32.xlu0 %v2873_v27  ;;  %v4785_v27 = vld [vmem:[%s6053_s8 + $0x60] sm:$0xff]  }
0x14cd   :  { %v2671_v29 = vpop.xlane.xlu0 %2670 }
0x14ce   :  { %v2668_v30 = vpop.xlane.xlu1 %2667  ;;  %v2673_v33 = vsub.f32 %v2665_v37, %v2671_v29  ;;  %v4786_v29 = vld [vmem:[%s6053_s8 + $0x68] sm:$0xff]  }
0x14cf   :  { %v2672_v31 = vsub.f32 %v2664_v14, %v2668_v30  ;;  %v4787_v30 = vld [vmem:[%s6053_s8 + $0x70] sm:$0xff]  }
0x14d0   :  { %v2676_v46 = vmul.f32 1.442695, %v2673_v33 }
0x14d1   :  { %v2872_v32 = vpop.xlane.xlu0 %2871  ;;  %v2674_v35 = vmul.f32 1.442695, %v2672_v31  ;;  %v4788_v31 = vld [vmem:[%s6053_s8 + $0x78] sm:$0xff]  }
0x14d2   :  { %v2876_v5 = vsub.f32 %v2868_v8, %v2872_v32 }
0x14d4   :  { %v2878_v28 = vmul.f32 1.442695, %v2876_v5 }
0x14d5   :  { %v2875_v38 = vpop.xlane.xlu0 %2874 }
0x14d6   :  { %4905 = vpow2.f32 %v2878_v28  ;;  %v2877_v40 = vsub.f32 %v2869_v24, %v2875_v38  ;;  %v4783_v24 = vld [vmem:[%s6053_s8 + $0x50] sm:$0xff]  }
0x14d7   :  { %4907 = vpow2.f32 %v2674_v35  ;;  %4446 = vmatpush3.bf16.msra.mxu0 %v4783_v24  ;;  %v4800_v24 = vld [vmem:[%s6055_s12 + $0xb4] ss:$8 sps:$4 sm:$0xff]  }
0x14d8   :  { %v2880_v34 = vmul.f32 1.442695, %v2877_v40  ;;  %4447 = vmatprep.subr.bf16.mxu0 %v4939_v0 }
0x14da   :  { %4909 = vpow2.f32 %v2880_v34 }
0x14db   :  { %4911 = vpow2.f32 %v2676_v46 }
0x14e0   :  { %v4906_v25 = vpop.eup %4905 }
0x14e1   :  { %v2882_v44 = vsel %vm580_vm3, %v4906_v25, 0.0  ;;  %v4908_v47 = vpop.eup %4907 }
0x14e2   :  { %2883 = vadd.xlane.f32.xlu1 %v2882_v44  ;;  %v2678_v13 = vsel %vm580_vm3, %v4908_v47, 0.0 }
0x14e4   :  { %v4910_v49 = vpop.eup %4909 }
0x14e5   :  { %v2885_v50 = vsel %vm580_vm3, %v4910_v49, 0.0  ;;  %v4912_v61 = vpop.eup %4911 }
0x14e6   :  { %2886 = vadd.xlane.f32.xlu0 %v2885_v50  ;;  %2679 = vadd.xlane.f32.xlu1 %v2678_v13  ;;  %v2681_v7 = vsel %vm580_vm3, %v4912_v61, 0.0 }
0x14ea   :  { %2682 = vadd.xlane.f32.xlu0 %v2681_v7 }
0x14f7   :  { %4637 = vrot.lane.b32.xlu1 %v5643_v4, %s4944_s28 }
0x14fb   :  { %4647 = vrot.lane.b32.xlu1 %v4646_v60, %s6089_s2 }
0x1500   :  { %4642 = vrot.lane.b32.xlu0 %v5643_v4, %s6089_s2 }
0x156f   :  { %v2884_v41 = vpop.xlane.xlu1 %2883 }
0x1573   :  { %v2887_v51 = vpop.xlane.xlu0 %2886  ;;  %v2680_v52 = vpop.xlane.xlu1 %2679 }
0x1574   :  { %4913 = vrcp.f32 %v2680_v52 }
0x1575   :  { %4915 = vrcp.f32 %v2884_v41 }
0x1577   :  { %v2683_v53 = vpop.xlane.xlu0 %2682  ;;  %v4638_v56 = vpop.permute.xlu1 %4637 }
0x1578   :  { %4917 = vrcp.f32 %v2683_v53  ;;  %v4640_v57 = vunpack.i.h.bf16 %v4638_v56  ;;  %v4639_v17 = vunpack.i.l.bf16 %v4638_v56 }
0x1579   :  { %4919 = vrcp.f32 %v2887_v51 }
0x157a   :  { %v4547_v62 = vpack.c.bf16 %v4640_v57, %v4639_v17  ;;  %v3980_v57 = vld [vmem:[%s6054_s9 + $0x1] ss:$0 sm:$0xff] }
0x157b   :  { %v4643_v63 = vpop.permute.xlu0 %4642  ;;  %v4648_v40 = vpop.permute.xlu1 %4647 }
0x157c   :  { %v4645_v26 = vunpack.i.h.bf16 %v4643_v63  ;;  %v4644_v3 = vunpack.i.l.bf16 %v4643_v63  ;;  %4548 = vmatprep.subr.bf16.mxu1 %v4547_v62  ;;  %v4650_v34 = vunpack.i.h.bf16 %v4648_v40 }
0x157d   :  { %4550 = vmatpush3.bf16.msra.mxu1 %v4547_v62 }
0x157e   :  { %v4557_v60 = vpack.c.bf16 %v4645_v26, %v4644_v3  ;;  %v4914_v15 = vpop.eup %4913  ;;  %v3004_v50 = vsel %vm488_vm1, %v5691_v58, %v4650_v34 }
0x157f   :  { %v5755_v4 = vmul.f32 %v4914_v15, %v4908_v47  ;;  %v4916_v18 = vpop.eup %4915 }
0x1580   :  { %4558 = vmatprep.subr.bf16.mxu1 %v4557_v60  ;;  %v5761_v39 = vmul.f32 %v4916_v18, %v4906_v25  ;;  %v4649_v25 = vunpack.i.l.bf16 %v4648_v40 }
0x1581   :  { %4424 = vmatprep.mubr.msk.f32.mxu1 %vm580_vm3, %v5755_v4 }
0x1582   :  { %v4918_v37 = vpop.eup %4917  ;;  %v3003_v13 = vsel %vm488_vm1, %v5693_v59, %v4649_v25 }
0x1583   :  { %v5759_v14 = vmul.f32 %v4918_v37, %v4912_v61  ;;  %v4920_v19 = vpop.eup %4919  ;;  %v4794_v37 = vld [vmem:[%s6055_s12 + $0x94] ss:$8 sps:$4 sm:$0xff]  }
0x1584   :  { %v5767_v8 = vmul.f32 %v4920_v19, %v4910_v49  ;;  %v4792_v19 = vld [vmem:[%s6055_s12 + $0x90] ss:$8 sps:$4 sm:$0xff]  }
0x1585   :  { %4425 = vmatmul.mubr.msk.f32.vlgmr.msra.gmra.mrb[36].mxu1 %vm580_vm3, %v5759_v14 }
0x1586   :  { %4560 = vmatpush3.bf16.msra.mxu1 %v4557_v60  ;;  %4438 = vmatprep.mubr.msk.f32.mxu1 %vm580_vm3, %v5761_v39 }
0x1589   :  { %4439 = vmatmul.mubr.msk.f32.vlgmr.msra.gmra.mrb[38].mxu1 %vm580_vm3, %v5767_v8 }
0x158a   :  { %3317 = vmatprep.mubr.bf16.mxu1 %v4941_v42  ;;  %v4784_v42 = vld [vmem:[%s6053_s8 + $0x58] sm:$0xff]   ;;  %s4948_s8 = smov 112  }
0x158b   :  { %4448 = vmatpush3.bf16.msra.mxu0 %v4784_v42  ;;  %v4798_v42 = vld [vmem:[%s6055_s12 + $0xb0] ss:$8 sps:$4 sm:$0xff]  }
0x158c   :  { %4449 = vmatprep.subr.bf16.mxu0 %v4939_v0 }
0x158f   :  { %4450 = vmatpush3.bf16.msra.mxu0 %v4785_v27  ;;  %v4803_v27 = vld [vmem:[%s6055_s12 + $0xc4] ss:$8 sps:$4 sm:$0xff]  }
0x1590   :  { %4451 = vmatprep.subr.bf16.mxu0 %v4939_v0 }
0x1593   :  { %4452 = vmatpush3.bf16.msra.mxu0 %v4786_v29  ;;  %v4801_v29 = vld [vmem:[%s6055_s12 + $0xc0] ss:$8 sps:$4 sm:$0xff]  }
0x1594   :  { %4453 = vmatprep.subr.bf16.mxu0 %v4939_v0 }
0x1597   :  { %4454 = vmatpush3.bf16.msra.mxu0 %v4787_v30  ;;  %v4806_v30 = vld [vmem:[%s6055_s12 + $0xd4] ss:$8 sps:$4 sm:$0xff]  }
0x1598   :  { %4455 = vmatprep.subr.bf16.mxu0 %v4939_v0 }
0x159b   :  { %4456 = vmatpush3.bf16.msra.mxu0 %v4788_v31  ;;  %v4804_v31 = vld [vmem:[%s6055_s12 + $0xd0] ss:$8 sps:$4 sm:$0xff]  }
0x1658   :  { %v4426_v32 = vpop.f32.mrb[36].mxu1 }
0x1659   :  { %v2766_v5 = vpop.f32.mrb[37].mxu1 }
0x165a   :  { %v4651_v33 = vpack.i.bf16 %v4426_v32, %v2766_v5  ;;  %v4809_v32 = vld [vmem:[%s6055_s12 + $0xe4] ss:$8 sps:$4 sm:$0xff]   ;;  %v4807_v5 = vld [vmem:[%s6055_s12 + $0xe0] ss:$8 sps:$4 sm:$0xff]  }
0x165c   :  { %4652 = vrot.lane.b32.xlu1 %v4651_v33, %s4944_s28  ;;  %v4440_v35 = vpop.f32.mrb[38].mxu1  ;;  %v4812_v33 = vld [vmem:[%s6055_s12 + $0xf4] ss:$8 sps:$4 sm:$0xff]  }
0x165d   :  { %v2970_v28 = vpop.f32.mrb[39].mxu1 }
0x165e   :  { %v4656_v38 = vpack.i.bf16 %v4440_v35, %v2970_v28  ;;  %v4810_v35 = vld [vmem:[%s6055_s12 + $0xf0] ss:$8 sps:$4 sm:$0xff]  }
0x1660   :  { %4657 = vrot.lane.b32.xlu1 %v4656_v38, %s4942_s27 }
0x16ce   :  { %v4653_v46 = vpop.permute.xlu1 %4652 }
0x16cf   :  { %v4655_v44 = vunpack.i.h.bf16 %v4653_v46  ;;  %v4654_v47 = vunpack.i.l.bf16 %v4653_v46 }
0x16d1   :  { %v3006_v41 = vsel %vm1324_vm4, %v3004_v50, %v4655_v44  ;;  %v3005_v51 = vsel %vm1324_vm4, %v3003_v13, %v4654_v47 }
0x16d2   :  { %v4658_v49 = vpop.permute.xlu1 %4657 }
0x16d3   :  { %v4660_v61 = vunpack.i.h.bf16 %v4658_v49  ;;  %v4659_v7 = vunpack.i.l.bf16 %v4658_v49 }
0x16d5   :  { %v3008_v52 = vsel %vm1327_vm5, %v3006_v41, %v4660_v61  ;;  %v3007_v53 = vsel %vm1327_vm5, %v3005_v51, %v4659_v7 }
0x16d6   :  { %v3009_v56 = vpack.c.bf16 %v3008_v52, %v3007_v53 }
0x16d8   :  { %4458 = vmatmul.mubr.bf16.vlgmr.msra.gmra.mrb[24].mxu0 %v3009_v56 }
0x17ab   :  { %v3117_v58 = vpop.f32.mrb[24].mxu0 }
0x17ac   :  { %v3118_v17 = vadd.f32 %v3980_v57, %v3117_v58  ;;  %v4459_v62 = vpop.f32.mrb[25].mxu0  ;;  %v3991_v58 = vld [vmem:[%s6056_s10 + $0x1] ss:$0 sm:$0xff] }
0x17ad   :  { %v3120_v59 = vpop.f32.mrb[26].mxu0 }
0x17ae   :  { %v5817_v63 = vadd.f32 %v3118_v17, %v5534_v36  ;;  %v3121_v26 = vadd.f32 %v3980_v57, %v3120_v59  ;;  %v4460_v3 = vpop.f32.mrb[27].mxu0  ;;  %v4791_v36 = vld [vmem:[%s6055_s12 + $0x84] ss:$8 sps:$4 sm:$0xff]  }
0x17af   :  { %3285 = vmatprep.subr.bf16.mxu1 %v4791_v36  ;;  %v3992_v3 = vld [vmem:[%s6057_s11 + $0x1] ss:$0 sm:$0xff] }
0x17b0   :  { %v5820_v60 = vadd.f32 %v3121_v26, %v5537_v48  ;;  %3130 = vadd.xlane.f32.xlu0 %v5817_v63  ;;  %v3134_v15 = vmul.f32 %v5817_v63, %v5817_v63  ;;  %v4789_v48 = vld [vmem:[%s6055_s12 + $0x80] ss:$8 sps:$4 sm:$0xff]  }
0x17b1   :  { %3286 = vmatpush1.bf16.msra.mxu1 %v4789_v48 }
0x17b2   :  { %3132 = vadd.xlane.f32.xlu1 %v5820_v60  ;;  %v3135_v18 = vmul.f32 %v5820_v60, %v5820_v60  ;;  %3287 = vmatprep.subr.bf16.mxu1 %v4794_v37  ;;  %v4813_v37 = vld [vmem:[%s6058_s14 + $0xc0] sm:$0xff]  }
0x17b3   :  { %4218 = vmatprep.subr.bf16.mxu0 %v4813_v37 }
0x17b4   :  { %3136 = vadd.xlane.f32.xlu0 %v3134_v15 }
0x17b5   :  { %3288 = vmatpush1.bf16.msra.mxu1 %v4792_v19  ;;  %v4814_v19 = vld [vmem:[%s6058_s14 + $0x80] sm:$0xff]  }
0x17b6   :  { %3289 = vmatprep.subr.bf16.mxu1 %v4797_v12  ;;  %4219 = vmatpush3.bf16.msra.mxu0 %v4814_v19  ;;  %v4815_v12 = vld [vmem:[%s6058_s14 + $0xc8] sm:$0xff]  }
0x17b7   :  { %4220 = vmatprep.subr.bf16.mxu0 %v4815_v12 }
0x17b8   :  { %3138 = vadd.xlane.f32.xlu0 %v3135_v18 }
0x17b9   :  { %3290 = vmatpush1.bf16.msra.mxu1 %v4795_v23  ;;  %v4816_v23 = vld [vmem:[%s6058_s14 + $0x88] sm:$0xff]  }
0x17ba   :  { %3291 = vmatprep.subr.bf16.mxu1 %v4800_v24  ;;  %4221 = vmatpush3.bf16.msra.mxu0 %v4816_v23  ;;  %v4817_v24 = vld [vmem:[%s6058_s14 + $0xd0] sm:$0xff]  }
0x17bb   :  { %4222 = vmatprep.subr.bf16.mxu0 %v4817_v24 }
0x17bd   :  { %3292 = vmatpush1.bf16.msra.mxu1 %v4798_v42  ;;  %v4818_v42 = vld [vmem:[%s6058_s14 + $0x90] sm:$0xff]  }
0x17be   :  { %3293 = vmatprep.subr.bf16.mxu1 %v4803_v27  ;;  %4223 = vmatpush3.bf16.msra.mxu0 %v4818_v42  ;;  %v4819_v27 = vld [vmem:[%s6058_s14 + $0xd8] sm:$0xff]  }
0x17bf   :  { %4224 = vmatprep.subr.bf16.mxu0 %v4819_v27 }
0x17c1   :  { %3294 = vmatpush1.bf16.msra.mxu1 %v4801_v29  ;;  %v4820_v29 = vld [vmem:[%s6058_s14 + $0x98] sm:$0xff]  }
0x17c2   :  { %3295 = vmatprep.subr.bf16.mxu1 %v4806_v30  ;;  %4225 = vmatpush3.bf16.msra.mxu0 %v4820_v29  ;;  %v4821_v30 = vld [vmem:[%s6058_s14 + $0xe0] sm:$0xff]  }
0x17c3   :  { %4226 = vmatprep.subr.bf16.mxu0 %v4821_v30 }
0x17c5   :  { %3296 = vmatpush1.bf16.msra.mxu1 %v4804_v31  ;;  %v4822_v31 = vld [vmem:[%s6058_s14 + $0xa0] sm:$0xff]  }
0x17c6   :  { %3297 = vmatprep.subr.bf16.mxu1 %v4809_v32  ;;  %4227 = vmatpush3.bf16.msra.mxu0 %v4822_v31  ;;  %v4823_v32 = vld [vmem:[%s6058_s14 + $0xe8] sm:$0xff]  }
0x17c7   :  { %4228 = vmatprep.subr.bf16.mxu0 %v4823_v32 }
0x17c9   :  { %3298 = vmatpush1.bf16.msra.mxu1 %v4807_v5  ;;  %v4824_v5 = vld [vmem:[%s6058_s14 + $0xa8] sm:$0xff]  }
0x17ca   :  { %3299 = vmatprep.subr.bf16.mxu1 %v4812_v33  ;;  %4229 = vmatpush3.bf16.msra.mxu0 %v4824_v5  ;;  %v4825_v33 = vld [vmem:[%s6058_s14 + $0xf0] sm:$0xff]  }
0x17cb   :  { %4230 = vmatprep.subr.bf16.mxu0 %v4825_v33 }
0x17cd   :  { %3300 = vmatpush1.bf16.msra.mxu1 %v4810_v35  ;;  %v4826_v35 = vld [vmem:[%s6058_s14 + $0xb0] sm:$0xff]  }
0x17ce   :  { %4461 = vmatprep.subr.bf16.mxu1 %v4939_v0  ;;  %4231 = vmatpush3.bf16.msra.mxu0 %v4826_v35 }
0x183d   :  { %v3131_v28 = vpop.xlane.xlu0 %3130 }
0x183e   :  { %v3140_v38 = vmul.f32 0.0078125, %v3131_v28  ;;  %v4827_v28 = vld [vmem:[%s6058_s14 + $0xf8] sm:$0xff]  }
0x183f   :  { %v3133_v40 = vpop.xlane.xlu1 %3132  ;;  %4232 = vmatprep.subr.bf16.mxu0 %v4827_v28 }
0x1840   :  { %v3144_v34 = vmul.f32 %v3140_v38, %v3140_v38  ;;  %v3141_v25 = vmul.f32 0.0078125, %v3133_v40  ;;  %v3150_v53 = vsub.f32 %v5817_v63, %v3140_v38  ;;  %v4828_v38 = vld [vmem:[%s6058_s14 + $0xb8] sm:$0xff]   ;;  %v4009_v40 = vld [vmem:[%s6059_s13 + $0x2] sm:$0x3] }
0x1841   :  { %v3137_v46 = vpop.xlane.xlu0 %3136  ;;  %4233 = vmatpush3.bf16.msra.mxu0 %v4828_v38 }
0x1842   :  { %v3142_v44 = vmul.f32 0.0078125, %v3137_v46  ;;  %v3145_v50 = vmul.f32 %v3141_v25, %v3141_v25  ;;  %v3151_v17 = vsub.f32 %v5820_v60, %v3141_v25  ;;  %v3198_v46 = vrot.slane %v4009_v40, %v5209_v16 }
0x1844   :  { %v3146_v47 = vsub.f32 %v3142_v44, %v3144_v34  ;;  %v3202_v34 = vrot.slane %v4009_v40, %v5216_v20 }
0x1845   :  { %v3139_v49 = vpop.xlane.xlu0 %3138 }
0x1846   :  { %v3148_v13 = vmax.f32 %v3146_v47, 0.0  ;;  %v3143_v61 = vmul.f32 0.0078125, %v3139_v49 }
0x1848   :  { %v3152_v7 = vadd.f32 1e-12, %v3148_v13  ;;  %v3147_v41 = vsub.f32 %v3143_v61, %v3145_v50 }
0x184a   :  { %4921 = vrsqrt.f32 %v3152_v7  ;;  %v3149_v51 = vmax.f32 %v3147_v41, 0.0 }
0x184c   :  { %v3153_v52 = vadd.f32 1e-12, %v3149_v51 }
0x184e   :  { %4923 = vrsqrt.f32 %v3153_v52 }
0x1854   :  { %v4922_v56 = vpop.eup %4921 }
0x1855   :  { %v3156_v57 = vmul.f32 %v4922_v56, %v3150_v53 }
0x1857   :  { %v3164_v26 = vmul.f32 %v3991_v58, %v3156_v57 }
0x1858   :  { %v4924_v62 = vpop.eup %4923 }
0x1859   :  { %v3157_v59 = vmul.f32 %v4924_v62, %v3151_v17  ;;  %v3172_v18 = vadd.f32 %v3992_v3, %v3164_v26 }
0x185b   :  { %v3165_v15 = vmul.f32 %v3991_v58, %v3157_v59 }
0x185d   :  { %v3173_v36 = vadd.f32 %v3992_v3, %v3165_v15 }
0x185f   :  { %v3174_v48 = vpack.c.bf16 %v3173_v36, %v3172_v18 }
0x1861   :  { %3318 = vmatmul.mubr.bf16.vlgmr.msra.gmra.mrb[40].mxu1 %v3174_v48 }
0x1862   :  { %4477 = vmatprep.mubr.msk.bf16.mxu1 %vm4940_vm0, %v4939_v0 }
0x1934   :  { %v3319_v25 = vpop.f32.mrb[40].mxu1 }
0x1935   :  { %v3320_v44 = vadd.f32 %v3319_v25, %v3198_v46  ;;  %v3321_v47 = vpop.f32.mrb[41].mxu1 }
0x1936   :  { %v3322_v49 = vadd.f32 %v3321_v47, %v3202_v34  ;;  %v3323_v50 = vpop.f32.mrb[42].mxu1 }
0x1937   :  { %v3328_v13 = vmul.f32 %v3320_v44, %v3320_v44  ;;  %v3324_v61 = vadd.f32 %v3323_v50, %v3198_v46  ;;  %v3325_v7 = vpop.f32.mrb[43].mxu1  ;;  %v4059_v50 = vld [vmem:[%s6060_s15 + $0x1] ss:$0 sm:$0xff] }
0x1938   :  { %v3329_v41 = vmul.f32 %v3322_v49, %v3322_v49  ;;  %v3326_v51 = vadd.f32 %v3325_v7, %v3202_v34 }
0x1939   :  { %v3332_v52 = vmul.f32 %v3328_v13, %v3320_v44  ;;  %v3330_v53 = vmul.f32 %v3324_v61, %v3324_v61 }
0x193a   :  { %v3333_v56 = vmul.f32 %v3329_v41, %v3322_v49  ;;  %v3331_v57 = vmul.f32 %v3326_v51, %v3326_v51 }
0x193b   :  { %v3336_v58 = vmul.f32 0.044715, %v3332_v52  ;;  %v3334_v17 = vmul.f32 %v3330_v53, %v3324_v61 }
0x193c   :  { %v3337_v62 = vmul.f32 0.044715, %v3333_v56  ;;  %v3335_v16 = vmul.f32 %v3331_v57, %v3326_v51 }
0x193d   :  { %v3340_v59 = vadd.f32 %v3336_v58, %v3320_v44  ;;  %v3338_v20 = vmul.f32 0.044715, %v3334_v17  ;;  %v4831_v58 = vld [vmem:[%s6061_s18 + $0x10] sm:$0xff]   ;;  %v4832_v17 = vld [vmem:[%s6061_s18 + $0x18] sm:$0xff]  }
0x193e   :  { %v3341_v26 = vadd.f32 %v3337_v62, %v3322_v49  ;;  %v3339_v3 = vmul.f32 0.044715, %v3335_v16 }
0x193f   :  { %v3344_v15 = vmul.f32 0.7978846, %v3340_v59  ;;  %v3342_v18 = vadd.f32 %v3338_v20, %v3324_v61 }
0x1940   :  { %v3345_v36 = vmul.f32 0.7978846, %v3341_v26  ;;  %v3343_v48 = vadd.f32 %v3339_v3, %v3326_v51 }
0x1941   :  { %4925 = vtanh.f32 %v3344_v15  ;;  %v3346_v37 = vmul.f32 0.7978846, %v3342_v18 }
0x1942   :  { %4927 = vtanh.f32 %v3345_v36  ;;  %v3347_v19 = vmul.f32 0.7978846, %v3343_v48 }
0x1943   :  { %4929 = vtanh.f32 %v3346_v37 }
0x1944   :  { %4931 = vtanh.f32 %v3347_v19 }
0x194b   :  { %v4926_v12 = vpop.eup %4925 }
0x194c   :  { %v4928_v23 = vpop.eup %4927  ;;  %v3352_v24 = vadd.f32 1.0, %v4926_v12 }
0x194d   :  { %v4930_v42 = vpop.eup %4929  ;;  %v3353_v27 = vadd.f32 1.0, %v4928_v23 }
0x194e   :  { %v4932_v29 = vpop.eup %4931  ;;  %v3356_v30 = vmul.f32 0.5, %v3352_v24  ;;  %v3354_v31 = vadd.f32 1.0, %v4930_v42 }
0x194f   :  { %v3355_v32 = vadd.f32 1.0, %v4932_v29  ;;  %v3357_v5 = vmul.f32 0.5, %v3353_v27 }
0x1950   :  { %v3358_v33 = vmul.f32 0.5, %v3354_v31  ;;  %v3360_v28 = vmul.f32 %v3356_v30, %v3320_v44  ;;  %v4076_v30 = vld [vmem:[%s6062_s16] ss:$0 sm:$0xff] }
0x1951   :  { %v3359_v35 = vmul.f32 0.5, %v3355_v32  ;;  %v3361_v40 = vmul.f32 %v3357_v5, %v3322_v49 }
0x1952   :  { %v3362_v38 = vmul.f32 %v3358_v33, %v3324_v61 }
0x1953   :  { %v3363_v46 = vmul.f32 %v3359_v35, %v3326_v51 }
0x1954   :  { %v3364_v34 = vpack.c.bf16 %v3362_v38, %v3360_v28 }
0x1955   :  { %v3365_v25 = vpack.c.bf16 %v3363_v46, %v3361_v40  ;;  %v4077_v46 = vld [vmem:[%s6063_s17] ss:$0 sm:$0xff] }
0x1957   :  { %3535 = vmatprep.mubr.bf16.mxu0 %v3365_v25 }
0x1958   :  { %3536 = vmatmul.mubr.bf16.vlgmr.msra.gmra.mrb[28].mxu0 %v3364_v34 }
0x1a2b   :  { %v4234_v47 = vpop.f32.mrb[28].mxu0 }
0x1a2c   :  { %v4235_v13 = vpop.f32.mrb[29].mxu0 }
0x1a2d   :  { %v4236_v7 = vadd.f32 %v4235_v13, %v4234_v47  ;;  %v4237_v41 = vpop.f32.mrb[30].mxu0 }
0x1a2e   :  { %v4238_v52 = vpop.f32.mrb[31].mxu0 }
0x1a2f   :  { %v3538_v53 = vadd.f32 %v4236_v7, %v4059_v50  ;;  %v4239_v56 = vadd.f32 %v4238_v52, %v4237_v41 }
0x1a31   :  { %v3541_v57 = vadd.f32 %v4239_v56, %v4059_v50  ;;  %v5944_v44 = vadd.f32 %v3538_v53, %v5817_v63  ;;  %v4829_v63 = vld [vmem:[%s6061_s18] sm:$0xff]  }
0x1a32   :  { %4462 = vmatpush3.bf16.msra.mxu1 %v4829_v63 }
0x1a33   :  { %3548 = vadd.xlane.f32.xlu0 %v5944_v44  ;;  %v5948_v49 = vadd.f32 %v3541_v57, %v5820_v60  ;;  %v3552_v61 = vmul.f32 %v5944_v44, %v5944_v44  ;;  %4463 = vmatprep.subr.bf16.mxu1 %v4939_v0  ;;  %v4830_v60 = vld [vmem:[%s6061_s18 + $0x8] sm:$0xff]  }
0x1a35   :  { %3550 = vadd.xlane.f32.xlu1 %v5948_v49  ;;  %v3553_v51 = vmul.f32 %v5948_v49, %v5948_v49 }
0x1a36   :  { %4464 = vmatpush3.bf16.msra.mxu1 %v4830_v60 }
0x1a37   :  { %3554 = vadd.xlane.f32.xlu0 %v3552_v61  ;;  %4465 = vmatprep.subr.bf16.mxu1 %v4939_v0 }
0x1a39   :  { %3556 = vadd.xlane.f32.xlu1 %v3553_v51 }
0x1a3a   :  { %4466 = vmatpush3.bf16.msra.mxu1 %v4831_v58 }
0x1a3b   :  { %4467 = vmatprep.subr.bf16.mxu1 %v4939_v0 }
0x1a3e   :  { %4468 = vmatpush3.bf16.msra.mxu1 %v4832_v17 }
0x1a3f   :  { %4469 = vmatprep.subr.bf16.mxu1 %v4939_v0 }
0x1a4a   :  { %3709 = vrot.lane.b32.xlu1 %v5317_v2, %s4945_s24  ;;  %v4834_v2 = vld [vmem:[%s6061_s18 + $0x28] sm:$0xff]  }
0x1a4d   :  { %3707 = vrot.lane.b32.xlu0 %v5315_v1, %s4945_s24  ;;  %v4833_v1 = vld [vmem:[%s6061_s18 + $0x20] sm:$0xff]  }
0x1a4e   :  { %3713 = vrot.lane.b32.xlu1 %v5344_v6, %s6089_s2  ;;  %4470 = vmatpush3.bf16.msra.mxu1 %v4833_v1  ;;  %v4835_v6 = vld [vmem:[%s6061_s18 + $0x30] sm:$0xff]  }
0x1a4f   :  { %4471 = vmatprep.subr.bf16.mxu1 %v4939_v0 }
0x1a51   :  { %3719 = vrot.lane.b32.xlu0 %v5350_v21, %s4946_s5 }
0x1a52   :  { %3715 = vrot.lane.b32.xlu1 %v5348_v11, %s6089_s2  ;;  %4472 = vmatpush3.bf16.msra.mxu1 %v4834_v2  ;;  %v4836_v11 = vld [vmem:[%s6061_s18 + $0x38] sm:$0xff]  }
0x1a53   :  { %4473 = vmatprep.subr.bf16.mxu1 %v4939_v0 }
0x1a55   :  { %3725 = vrot.lane.b32.xlu0 %v5679_v54, %s4944_s28 }
0x1a56   :  { %3721 = vrot.lane.b32.xlu1 %v5356_v22, %s4946_s5  ;;  %4474 = vmatpush3.bf16.msra.mxu1 %v4835_v6 }
0x1a57   :  { %4475 = vmatprep.subr.bf16.mxu1 %v4939_v0 }
0x1a59   :  { %3731 = vrot.lane.b32.xlu0 %v5719_v45, %s4947_s30 }
0x1a5a   :  { %3727 = vrot.lane.b32.xlu1 %v5681_v55, %s4944_s28  ;;  %4476 = vmatpush3.bf16.msra.mxu1 %v4836_v11 }
0x1a5d   :  { %3737 = vrot.lane.b32.xlu0 %v5755_v4, %s4942_s27 }
0x1a5e   :  { %3733 = vrot.lane.b32.xlu1 %v5721_v43, %s4947_s30 }
0x1a61   :  { %3743 = vrot.lane.b32.xlu0 %v5761_v39, %s4948_s8 }
0x1a62   :  { %3739 = vrot.lane.b32.xlu1 %v5759_v14, %s4942_s27 }
0x1a66   :  { %3745 = vrot.lane.b32.xlu1 %v5767_v8, %s4948_s8 }
0x1ac0   :  { %v3549_v21 = vpop.xlane.xlu0 %3548 }
0x1ac1   :  { %v3558_v22 = vmul.f32 0.0078125, %v3549_v21 }
0x1ac2   :  { %v3551_v54 = vpop.xlane.xlu1 %3550 }
0x1ac3   :  { %v3559_v55 = vmul.f32 0.0078125, %v3551_v54  ;;  %v3562_v45 = vmul.f32 %v3558_v22, %v3558_v22  ;;  %v3568_v24 = vsub.f32 %v5944_v44, %v3558_v22 }
0x1ac4   :  { %v3555_v0 = vpop.xlane.xlu0 %3554 }
0x1ac5   :  { %v3560_v43 = vmul.f32 0.0078125, %v3555_v0  ;;  %v3563_v62 = vmul.f32 %v3559_v55, %v3559_v55  ;;  %v3569_v31 = vsub.f32 %v5948_v49, %v3559_v55 }
0x1ac6   :  { %v3557_v4 = vpop.xlane.xlu1 %3556 }
0x1ac7   :  { %v3564_v16 = vsub.f32 %v3560_v43, %v3562_v45  ;;  %v3561_v59 = vmul.f32 0.0078125, %v3557_v4 }
0x1ac8   :  { %v3708_v20 = vpop.permute.xlu0 %3707 }
0x1ac9   :  { %v3566_v26 = vmax.f32 %v3564_v16, 0.0  ;;  %v3565_v3 = vsub.f32 %v3561_v59, %v3563_v62  ;;  %v3749_v19 = vsel %vm580_vm3, %v5268_v9, %v3708_v20 }
0x1aca   :  { %v3710_v39 = vpop.permute.xlu1 %3709 }
0x1acb   :  { %v3570_v15 = vadd.f32 1e-12, %v3566_v26  ;;  %v3567_v18 = vmax.f32 %v3565_v3, 0.0  ;;  %v3750_v53 = vsel %vm580_vm3, %v5270_v10, %v3710_v39  ;;  %v4078_v10 = vld [vmem:[%s6065_s19] ss:$0 sm:$0xff] }
0x1acc   :  { %v3720_v14 = vpop.permute.xlu0 %3719 }
0x1acd   :  { %4933 = vrsqrt.f32 %v3570_v15  ;;  %v3571_v8 = vadd.f32 1e-12, %v3567_v18 }
0x1ace   :  { %v3714_v36 = vpop.permute.xlu1 %3713 }
0x1acf   :  { %4935 = vrsqrt.f32 %v3571_v8  ;;  %v3751_v12 = vsel %vm488_vm1, %v3749_v19, %v3714_v36 }
0x1ad0   :  { %v3726_v48 = vpop.permute.xlu0 %3725  ;;  %v3754_v29 = vsel %vm3753_vm6, %v3751_v12, %v3720_v14 }
0x1ad1   :  { %v3756_v33 = vsel %vm1324_vm4, %v3754_v29, %v3726_v48 }
0x1ad2   :  { %v3716_v37 = vpop.permute.xlu1 %3715 }
0x1ad3   :  { %v3752_v56 = vsel %vm488_vm1, %v3750_v53, %v3716_v37 }
0x1ad4   :  { %v3732_v23 = vpop.permute.xlu0 %3731 }
0x1ad5   :  { %v3759_v40 = vsel %vm3758_vm7, %v3756_v33, %v3732_v23 }
0x1ad6   :  { %v3722_v42 = vpop.permute.xlu1 %3721 }
0x1ad7   :  { %v4934_v27 = vpop.eup %4933  ;;  %v3755_v44 = vsel %vm3753_vm6, %v3752_v56, %v3722_v42 }
0x1ad8   :  { %v3738_v32 = vpop.permute.xlu0 %3737  ;;  %v3574_v5 = vmul.f32 %v4934_v27, %v3568_v24 }
0x1ad9   :  { %v4936_v9 = vpop.eup %4935  ;;  %v3761_v34 = vsel %vm1327_vm5, %v3759_v40, %v3738_v32 }
0x1ada   :  { %v3728_v35 = vpop.permute.xlu1 %3727  ;;  %v3575_v28 = vmul.f32 %v4936_v9, %v3569_v31  ;;  %v3582_v38 = vmul.f32 %v4076_v30, %v3574_v5 }
0x1adb   :  { %v3757_v49 = vsel %vm1324_vm4, %v3755_v44, %v3728_v35 }
0x1adc   :  { %v3744_v25 = vpop.permute.xlu0 %3743  ;;  %v3583_v47 = vmul.f32 %v4076_v30, %v3575_v28  ;;  %v3590_v7 = vadd.f32 %v4077_v46, %v3582_v38 }
0x1add   :  { %v3764_v50 = vsel %vm3763_vm8, %v3761_v34, %v3744_v25 }
0x1ade   :  { %3766 = vst [vmem:[%s6064_s21] sm:$0xff] %v3764_v50  ;;  %v3734_v13 = vpop.permute.xlu1 %3733  ;;  %v3591_v41 = vadd.f32 %v4077_v46, %v3583_v47 }
0x1adf   :  { %v3760_v61 = vsel %vm3758_vm7, %v3757_v49, %v3734_v13 }
0x1ae0   :  { %v3592_v52 = vpack.c.bf16 %v3591_v41, %v3590_v7 }
0x1ae2   :  { %v3740_v57 = vpop.permute.xlu1 %3739  ;;  %4478 = vmatmul.mubr.bf16.vlgmr.msra.gmra.mrb[44].mxu1 %v3592_v52 }
0x1ae3   :  { %v3762_v51 = vsel %vm1327_vm5, %v3760_v61, %v3740_v57 }
0x1ae6   :  { %v3746_v63 = vpop.permute.xlu1 %3745 }
0x1ae7   :  { %v3765_v60 = vsel %vm3763_vm8, %v3762_v51, %v3746_v63 }
0x1ae8   :  { %3767 = vst [vmem:[%s6064_s21 + $0x8] sm:$0xff] %v3765_v60 }
0x1bb5   :  { %v3698_v58 = vpop.f32.mrb[44].mxu1 }
0x1bb6   :  { %v3699_v17 = vadd.f32 %v4078_v10, %v3698_v58  ;;  %v4479_v1 = vpop.f32.mrb[45].mxu1 }
0x1bb7   :  { %v3701_v2 = vpop.f32.mrb[46].mxu1 }
0x1bb8   :  { %3705 = vst [vmem:[%s6066_s20] sm:$0xff] %v3699_v17  ;;  %v3702_v6 = vadd.f32 %v4078_v10, %v3701_v2  ;;  %v4480_v11 = vpop.f32.mrb[47].mxu1 }
0x1bba   :  { %3706 = vst [vmem:[%s6066_s20 + $0x8] sm:$0xff] %v3702_v6 }

</bundles_post_ra>
